<compile_context>
chip_gen: v7x
topology: tpu7x:2x2x1
jax: 0.10.0
libtpu: 0.0.40
codegen_flags: <defaults>
</compile_context>

<pallas_src>
import functools

import jax
import jax.numpy as jnp
from jax import lax
from jax.experimental import pallas as pl
from jax.experimental.pallas import tpu as pltpu


def _round_up(a, b):
    return ((a + b - 1) // b) * b


def _cdiv(a, b):
    return -(-a // b)


# ----------------------------------------------------------------------------
# Kernels
# ----------------------------------------------------------------------------
def _mlp_resident_kernel(x_ref, w1_ref, b1_ref, w2_ref, b2_ref, o_ref, *,
                         precision):
    # Layer 1: MXU matmul (native-dtype operands, f32 accumulation) + bias +
    # tanh (EUP, f32 so v5e's no-bf16 VPU/EUP path is unaffected).
    h = jnp.dot(x_ref[...], w1_ref[...],
                preferred_element_type=jnp.float32, precision=precision)
    h = jnp.tanh(h + b1_ref[...].astype(jnp.float32))
    # Layer 2: MXU matmul + bias, single store at the true output width.
    y = jnp.dot(h.astype(w2_ref.dtype), w2_ref[...],
                preferred_element_type=jnp.float32, precision=precision)
    o_ref[...] = (y + b2_ref[...].astype(jnp.float32)).astype(o_ref.dtype)


def _mlp_hidden_chunked_kernel(x_ref, w1_ref, b1_ref, w2_ref, b2_ref, o_ref,
                               acc_ref, *, precision):
    # Fallback path: hidden dim is a grid axis; W1/W2 stream chunk-by-chunk.
    #   y = sum_h tanh(x @ W1[:, h] + b1[h]) @ W2[h, :] + b2   (exact)
    hi = pl.program_id(1)

    @pl.when(hi == 0)
    def _init():
        acc_ref[...] = jnp.zeros_like(acc_ref)

    h = jnp.dot(x_ref[...], w1_ref[...],
                preferred_element_type=jnp.float32, precision=precision)
    h = jnp.tanh(h + b1_ref[...].astype(jnp.float32))
    acc_ref[...] += jnp.dot(h.astype(w2_ref.dtype), w2_ref[...],
                            preferred_element_type=jnp.float32,
                            precision=precision)

    @pl.when(hi == pl.num_programs(1) - 1)
    def _finalize():
        o_ref[...] = (acc_ref[...] + b2_ref[...].astype(jnp.float32)
                      ).astype(o_ref.dtype)


# ----------------------------------------------------------------------------
# Wrapper
# ----------------------------------------------------------------------------
def mlp_forward(x, w1, b1, w2, b2, *, tile_n_cap=512, tile_h=512,
                precision=None, vmem_budget_bytes=48 * 1024 * 1024):
    """y = tanh(x @ W1 + b1) @ W2 + b2, tiled over the batch dimension.

    No per-call padding of x or the output.  If the fully-resident weights fit
    the VMEM budget, both matmuls run against resident W1/W2; otherwise the
    hidden dim becomes an "arbitrary" contraction grid axis with a VMEM f32
    accumulator (v7x 64 MiB safe).
    """
    n, indim = x.shape
    hidden = w1.shape[1]
    outdim = w2.shape[1]
    b1 = b1.reshape(1, hidden)
    b2 = b2.reshape(1, outdim)

    out_dtype = x.dtype
    x_item = jnp.dtype(x.dtype).itemsize
    o_item = jnp.dtype(out_dtype).itemsize
    w_item = jnp.dtype(w1.dtype).itemsize

    # Batch tile: respect the sublane packing granule (8 f32 / 16 bf16 /
    # 32 int8), aim for >= 4 grid steps when n allows it, cap at tile_n_cap.
    granule = max(8, 32 // x_item)
    tile_n = max(granule,
                 min(_round_up(tile_n_cap, granule),
                     _round_up(_cdiv(n, 4), granule)))
    tile_n = min(tile_n, _round_up(n, granule))
    grid_n = _cdiv(n, tile_n)          # last block may be partial; rows indep.

    # --- VMEM accounting (2 buffers per pipelined input by default) ---------
    x_tile_b = tile_n * indim * x_item
    y_tile_b = tile_n * outdim * o_item
    resident_need = (
        2 * (w1.size + w2.size + hidden + outdim) * w_item   # resident W/b
        + 2 * x_tile_b + 2 * y_tile_b                         # streamed x / y
        + tile_n * hidden * 4 + tile_n * outdim * 4)          # f32 h / y acc
    use_resident = resident_need + (2 << 20) <= vmem_budget_bytes

    tile_h_eff = min(_round_up(tile_h, 128), _round_up(hidden, 128))
    hidden_p = _round_up(hidden, tile_h_eff)
    num_h = hidden_p // tile_h_eff
    chunk_need = (
        2 * (indim * tile_h_eff + tile_h_eff * outdim
             + tile_h_eff + outdim) * w_item
        + 2 * x_tile_b + 2 * y_tile_b
        + tile_n * tile_h_eff * 4 + tile_n * outdim * 4)

    need = resident_need if use_resident else chunk_need
    vmem_limit = int(min(max(need + need // 4 + (4 << 20), 32 << 20),
                         64 << 20))

    # --- advisory cost estimate (unpadded) ----------------------------------
    weight_bytes = int((w1.size + w2.size + hidden + outdim) * w_item)
    if not use_resident:
        weight_bytes *= grid_n         # chunked path re-streams W per x tile
    cost = pl.CostEstimate(
        flops=int(2 * n * hidden * (indim + outdim)),
        transcendentals=int(n * hidden),
        bytes_accessed=int(x.size * x_item + weight_bytes
                           + n * outdim * o_item),
    )

    if use_resident:
        kernel = functools.partial(_mlp_resident_kernel, precision=precision)
        return pl.pallas_call(
            kernel,
            out_shape=jax.ShapeDtypeStruct((n, outdim), out_dtype),
            grid_spec=pltpu.PrefetchScalarGridSpec(
                num_scalar_prefetch=0,
                grid=(grid_n,),
                in_specs=[
                    # x: one batch tile per grid step (streamed, double-buffered).
                    pl.BlockSpec((tile_n, indim), lambda i: (i, 0)),
                    # weights / biases: constant block index -> resident in VMEM.
                    pl.BlockSpec((indim, hidden), lambda i: (0, 0)),
                    pl.BlockSpec((1, hidden), lambda i: (0, 0)),
                    pl.BlockSpec((hidden, outdim), lambda i: (0, 0)),
                    pl.BlockSpec((1, outdim), lambda i: (0, 0)),
                ],
                out_specs=pl.BlockSpec((tile_n, outdim), lambda i: (i, 0)),
            ),
            compiler_params=pltpu.CompilerParams(
                dimension_semantics=("parallel",),
                vmem_limit_bytes=vmem_limit,
            ),
            cost_estimate=cost,
        )(x, w1, b1, w2, b2)

    # ---- hidden-chunked fallback (large weights / v7x 64 MiB VMEM) ---------
    # Zero-pad the hidden dim of the weights (only) to a multiple of the chunk
    # width; padded hidden columns contribute tanh(0)=0 and meet zero W2 rows,
    # so the math stays exact.
    pad_h = hidden_p - hidden
    if pad_h:
        w1 = jnp.pad(w1, ((0, 0), (0, pad_h)))
        b1 = jnp.pad(b1, ((0, 0), (0, pad_h)))
        w2 = jnp.pad(w2, ((0, pad_h), (0, 0)))

    kernel = functools.partial(_mlp_hidden_chunked_kernel, precision=precision)
    return pl.pallas_call(
        kernel,
        out_shape=jax.ShapeDtypeStruct((n, outdim), out_dtype),
        grid_spec=pltpu.PrefetchScalarGridSpec(
            num_scalar_prefetch=0,
            grid=(grid_n, num_h),
            in_specs=[
                pl.BlockSpec((tile_n, indim), lambda i, h: (i, 0)),
                pl.BlockSpec((indim, tile_h_eff), lambda i, h: (0, h)),
                pl.BlockSpec((1, tile_h_eff), lambda i, h: (0, h)),
                pl.BlockSpec((tile_h_eff, outdim), lambda i, h: (h, 0)),
                pl.BlockSpec((1, outdim), lambda i, h: (0, 0)),
            ],
            out_specs=pl.BlockSpec((tile_n, outdim), lambda i, h: (i, 0)),
            scratch_shapes=[pltpu.VMEM((tile_n, outdim), jnp.float32)],
        ),
        compiler_params=pltpu.CompilerParams(
            dimension_semantics=("parallel", "arbitrary"),
            vmem_limit_bytes=vmem_limit,
        ),
        cost_estimate=cost,
    )(x, w1, b1, w2, b2)


def init_params(key, indim, hidden, outdim, dtype=jnp.float32):
    """Deterministic synthetic parameters (PyTorch-Linear-like uniform init)."""
    k1, k2, k3, k4 = jax.random.split(key, 4)
    lim1 = 1.0 / jnp.sqrt(indim)
    lim2 = 1.0 / jnp.sqrt(hidden)
    w1 = jax.random.uniform(k1, (indim, hidden), dtype, -lim1, lim1)
    b1 = jax.random.uniform(k2, (1, hidden), dtype, -lim1, lim1)
    w2 = jax.random.uniform(k3, (hidden, outdim), dtype, -lim2, lim2)
    b2 = jax.random.uniform(k4, (1, outdim), dtype, -lim2, lim2)
    return w1, b1, w2, b2


if __name__ == "__main__":
    key = jax.random.PRNGKey(0)
    kx, kp = jax.random.split(key)

    # Tabular-MLP-ish shapes; batch not a multiple of the tile and feature
    # dims (32 in / 8 out) not multiples of 128 -> exercises the unpadded path.
    N, INDIM, HIDDEN, OUTDIM = 200, 32, 256, 8
    x = jax.random.normal(kx, (N, INDIM), dtype=jnp.float32)
    w1, b1, w2, b2 = init_params(kp, INDIM, HIDDEN, OUTDIM)

    hi = lax.Precision.HIGHEST

    # Pure-JAX reference of the same forward (same explicit MXU precision).
    y_ref = jnp.tanh(jnp.dot(x, w1, precision=hi) + b1)
    y_ref = jnp.dot(y_ref, w2, precision=hi) + b2

    # 1) Main path: resident weights, batch grid of 4 "parallel" steps.
    y = mlp_forward(x, w1, b1, w2, b2, precision=hi)
    y = jax.block_until_ready(y)
    assert y.shape == (N, OUTDIM)
    assert jnp.allclose(y, y_ref, atol=1e-5, rtol=1e-5)

    # 2) Hidden-chunked fallback (forced via a zero VMEM budget): grid (4, 2),
    #    contraction axis "arbitrary" with an f32 VMEM accumulator.
    y2 = mlp_forward(x, w1, b1, w2, b2, precision=hi,
                     tile_h=128, vmem_budget_bytes=0)
    y2 = jax.block_until_ready(y2)
    assert jnp.allclose(y2, y_ref, atol=1e-5, rtol=1e-5)

    print("KERNEL_OK")
</pallas_src>

<mosaic_0001>
module attributes {stable_mosaic.version = 11 : i64} {
  func.func @_mlp_resident_kernel(%arg0: i32, %arg1: memref<56x32xf32, #tpu.memory_space<vmem>>, %arg2: memref<32x256xf32, #tpu.memory_space<vmem>>, %arg3: memref<1x256xf32, #tpu.memory_space<vmem>>, %arg4: memref<256x8xf32, #tpu.memory_space<vmem>>, %arg5: memref<1x8xf32, #tpu.memory_space<vmem>>, %arg6: memref<56x8xf32, #tpu.memory_space<vmem>>) attributes {dimension_semantics = [#tpu.dimension_semantics<parallel>], iteration_bounds = array<i64: 4>, scalar_prefetch = 0 : i64, scratch_operands = 0 : i64, tpu.core_type = #tpu.core_type<tc>, window_params = [{transform_indices = @transform_0, window_bounds = array<i64: 56, 32>}, {pipeline_mode = #tpu.pipeline_mode<synchronous>, transform_indices = @transform_1, window_bounds = array<i64: 32, 256>}, {pipeline_mode = #tpu.pipeline_mode<synchronous>, transform_indices = @transform_2, window_bounds = array<i64: 1, 256>}, {pipeline_mode = #tpu.pipeline_mode<synchronous>, transform_indices = @transform_3, window_bounds = array<i64: 256, 8>}, {pipeline_mode = #tpu.pipeline_mode<synchronous>, transform_indices = @transform_4, window_bounds = array<i64: 1, 8>}, {transform_indices = @transform_5, window_bounds = array<i64: 56, 8>}]} {
    %c0 = arith.constant 0 : index
    %c0_0 = arith.constant 0 : index
    %0 = vector.load %arg1[%c0, %c0_0] : memref<56x32xf32, #tpu.memory_space<vmem>>, vector<56x32xf32>
    %c0_1 = arith.constant 0 : index
    %c0_2 = arith.constant 0 : index
    %1 = vector.load %arg2[%c0_1, %c0_2] : memref<32x256xf32, #tpu.memory_space<vmem>>, vector<32x256xf32>
    %cst = arith.constant dense<0.000000e+00> : vector<56x256xf32>
    %2 = tpu.matmul %0, %1, %cst {dimension_numbers = #tpu.dot_dimension_numbers<[1], [0], [0], [1], [0, 0, 1, 1], [], []>, precision = #tpu.contract_precision<fp32>} : vector<56x32xf32>, vector<32x256xf32>, vector<56x256xf32> -> vector<56x256xf32>
    %c0_3 = arith.constant 0 : index
    %c0_4 = arith.constant 0 : index
    %3 = vector.load %arg3[%c0_3, %c0_4] : memref<1x256xf32, #tpu.memory_space<vmem>>, vector<1x256xf32>
    %4 = vector.broadcast %3 : vector<1x256xf32> to vector<56x256xf32>
    %5 = arith.addf %2, %4 : vector<56x256xf32>
    %6 = math.tanh %5 : vector<56x256xf32>
    %c0_5 = arith.constant 0 : index
    %c0_6 = arith.constant 0 : index
    %7 = vector.load %arg4[%c0_5, %c0_6] : memref<256x8xf32, #tpu.memory_space<vmem>>, vector<256x8xf32>
    %cst_7 = arith.constant dense<0.000000e+00> : vector<56x8xf32>
    %8 = tpu.matmul %6, %7, %cst_7 {dimension_numbers = #tpu.dot_dimension_numbers<[1], [0], [0], [1], [0, 0, 1, 1], [], []>, precision = #tpu.contract_precision<fp32>} : vector<56x256xf32>, vector<256x8xf32>, vector<56x8xf32> -> vector<56x8xf32>
    %c0_8 = arith.constant 0 : index
    %c0_9 = arith.constant 0 : index
    %9 = vector.load %arg5[%c0_8, %c0_9] : memref<1x8xf32, #tpu.memory_space<vmem>>, vector<1x8xf32>
    %10 = vector.broadcast %9 : vector<1x8xf32> to vector<56x8xf32>
    %11 = arith.addf %8, %10 : vector<56x8xf32>
    %c0_10 = arith.constant 0 : index
    %c0_11 = arith.constant 0 : index
    %12 = vector.load %arg6[%c0_10, %c0_11] : memref<56x8xf32, #tpu.memory_space<vmem>>, vector<56x8xf32>
    tpu.vector_store %arg6[%c0_10, %c0_11], %11 {strides = array<i32>} : memref<56x8xf32, #tpu.memory_space<vmem>>, vector<56x8xf32>,
    return
  }
  func.func @transform_0(%arg0: i32) -> (i32, i32) {
    %c0_i32 = arith.constant 0 : i32
    %c0_i32_0 = arith.constant 0 : i32
    return %arg0, %c0_i32 : i32, i32
  }
  func.func @transform_1(%arg0: i32) -> (i32, i32) {
    %c0_i32 = arith.constant 0 : i32
    %c0_i32_0 = arith.constant 0 : i32
    %c0_i32_1 = arith.constant 0 : i32
    return %c0_i32, %c0_i32_0 : i32, i32
  }
  func.func @transform_2(%arg0: i32) -> (i32, i32) {
    %c0_i32 = arith.constant 0 : i32
    %c0_i32_0 = arith.constant 0 : i32
    %c0_i32_1 = arith.constant 0 : i32
    return %c0_i32, %c0_i32_0 : i32, i32
  }
  func.func @transform_3(%arg0: i32) -> (i32, i32) {
    %c0_i32 = arith.constant 0 : i32
    %c0_i32_0 = arith.constant 0 : i32
    %c0_i32_1 = arith.constant 0 : i32
    return %c0_i32, %c0_i32_0 : i32, i32
  }
  func.func @transform_4(%arg0: i32) -> (i32, i32) {
    %c0_i32 = arith.constant 0 : i32
    %c0_i32_0 = arith.constant 0 : i32
    %c0_i32_1 = arith.constant 0 : i32
    return %c0_i32, %c0_i32_0 : i32, i32
  }
  func.func @transform_5(%arg0: i32) -> (i32, i32) {
    %c0_i32 = arith.constant 0 : i32
    %c0_i32_0 = arith.constant 0 : i32
    return %arg0, %c0_i32 : i32, i32
  }
}

</mosaic_0001>

<bundles_post_ra>
// kernel: tpu_custom_call.1
= control target key start
LH: loop header
LB: loop body
LE: loop exit
PB: predicated region body
PF: predicated region fallthrough
CT: control target
= control target key end

     0   :  { %s3535_s18 = smov 0   ;;  %s3537_s19 = smov 0   ;;  %s4818_s0 = inlined_call_operand.vmem [shape: f32[200,32], index: 0, kind: input, shape index: {}]   ;;  %s4819_s1 = inlined_call_operand.vmem [shape: f32[32,256], index: 1, kind: input, shape index: {}]   ;;  %s4820_s2 = inlined_call_operand.vmem [shape: f32[1,256], index: 2, kind: input, shape index: {}]   ;;  %s4821_s3 = inlined_call_operand.vmem [shape: f32[256,8], index: 3, kind: input, shape index: {}]   ;;  %s4822_s4 = inlined_call_operand.vmem [shape: f32[1,8], index: 4, kind: input, shape index: {}]   ;;  %s4823_s5 = inlined_call_operand.vmem [shape: f32[200,8], index: 5, kind: output, shape index: {}]  }
   0x1   :  { %s3539_s20 = smov 0  }
   0x2 LB: > { %s3548_s21 = sadd.s32 4294967295, %s3470_s20   ;;  %s3550_s22 = sadd.s32 1, %s3470_s20   ;;  %s3470_s20 = sphi %s3539_s20, %s5072_s20   ;;  %s3466_s19 = sphi %s3537_s19, %s5071_s19   ;;  %s3462_s18 = sphi %s3535_s18, %s5070_s18  }
   0x3   : > { %s129_s23 = ssub.s32 %s3470_s20, %s3550_s22  ;;  %s132_s24 = sadd.s32 1, %s3466_s19 }
   0x4   : > { %p130_p0 = scmp.eq.s32.totalorder %s129_s23, 0  ;;  %p142_p1 = scmp.ne.s32.totalorder %s3466_s19, %s3462_s18 }
   0x5   : > { %p143_p2 = scmp.eq.s32.totalorder %s3548_s21, 3  ;;  %p2635_p3 = scmp.ge.s32.totalorder %s3470_s20, 1 }
   0x6   : > { %s3558_s25 = scalar_select %p130_p0, %s3466_s19, %s132_s24  }
   0x7   : > { %p3560_p4 = por %p143_p2, %p142_p1  ;;  %p196_p5 = scmp.lt.s32.totalorder %s3470_s20, 5 }
   0x9   : > { %p197_p6 = pnand %p2635_p3, %p196_p5 }
   0xb   : > { %200 = sbr.rel (%p197_p6) target bundleno = 821 (0x335), region = 40 }
  0x12   : > { %v3567_v0 = vld [vmem:[%s4819_s1 + $0x8] sm:$0xff]  ;;  %v3572_v1 = vld [vmem:[%s4819_s1 + $0x18] sm:$0xff]  ;;  %v3577_v2 = vld [vmem:[%s4819_s1] sm:$0xff]  ;;  %s3580_s8 = smul.u32 7, %s3548_s21  ;;  %v3504_v9 = vmov 0.0   ;;  %vm273_vm0 = vcmask 261120  }
  0x13   : > { %v295_v3 = vand.u32 4294901760, %v3567_v0  ;;  %v299_v4 = vand.u32 4294901760, %v3572_v1  ;;  %v3587_v5 = vld [vmem:[%s4819_s1 + $0x10] sm:$0xff]  ;;  %v297_v6 = vand.u32 4294901760, %v3577_v2  ;;  %v3593_v7 = vld [vmem:[%s4819_s1 + $0x28] sm:$0xff]  ;;  %v3598_v8 = vld [vmem:[%s4819_s1 + $0x38] sm:$0xff]  ;;  %549 = vmatprep.mubr.f32.mxu0 %v3504_v9  ;;  %367 = vmatprep.mubr.f32.mxu1 %v3504_v9 }
  0x14   : > { %v301_v10 = vand.u32 4294901760, %v3587_v5  ;;  %v303_v11 = vand.u32 4294901760, %v3593_v7  ;;  %v307_v12 = vand.u32 4294901760, %v3598_v8  ;;  %v3608_v13 = vld [vmem:[%s4819_s1 + $0x20] sm:$0xff]  ;;  %v3613_v14 = vld [vmem:[%s4819_s1 + $0x30] sm:$0xff]  ;;  %p232_p7 = scmp.lt.s32.totalorder %s3580_s8, 24 }
  0x15   : > { %v3619_v15 = vsub.f32 %v3567_v0, %v295_v3  ;;  %v3624_v16 = vsub.f32 %v3572_v1, %v299_v4  ;;  %v3629_v17 = vsub.f32 %v3577_v2, %v297_v6  ;;  %v305_v18 = vand.u32 4294901760, %v3608_v13 }
  0x16   : > { %v3635_v19 = vsub.f32 %v3587_v5, %v301_v10  ;;  %v3640_v20 = vsub.f32 %v3593_v7, %v303_v11  ;;  %v3645_v21 = vsub.f32 %v3598_v8, %v307_v12  ;;  %v309_v22 = vand.u32 4294901760, %v3613_v14  ;;  %s233_s23 = scalar_select %p232_p7, %s3580_s8, 24 }
  0x17   : > { %v447_v23 = vand.u32 4294901760, %v3619_v15  ;;  %v459_v24 = vand.u32 4294901760, %v3624_v16  ;;  %v453_v25 = vand.u32 4294901760, %v3629_v17  ;;  %v3655_v26 = vsub.f32 %v3608_v13, %v305_v18 }
  0x18   : > { %v465_v27 = vand.u32 4294901760, %v3635_v19  ;;  %v471_v28 = vand.u32 4294901760, %v3640_v20  ;;  %v483_v29 = vand.u32 4294901760, %v3645_v21  ;;  %v3663_v30 = vsub.f32 %v3613_v14, %v309_v22  ;;  %s2636_s24 = sshll.u32 %s233_s23, 3 }
  0x19   : > { %v448_v31 = vsub.f32 %v3619_v15, %v447_v23  ;;  %v460_v32 = vsub.f32 %v3624_v16, %v459_v24  ;;  %v454_v33 = vsub.f32 %v3629_v17, %v453_v25  ;;  %v477_v34 = vand.u32 4294901760, %v3655_v26  ;;  %s3676_s29 = scalar_lea.vmem %s4818_s0, %s2636_s24  ;;  %s224_s24 = sand.u32 1, %s3462_s18  }
  0x1a   : > { %v466_v35 = vsub.f32 %v3635_v19, %v465_v27  ;;  %v472_v36 = vsub.f32 %v3640_v20, %v471_v28  ;;  %v484_v37 = vsub.f32 %v3645_v21, %v483_v29  ;;  %v489_v38 = vand.u32 4294901760, %v3663_v30  ;;  %v246_v47 = vld [vmem:[%s3676_s29] sm:$0xff]  ;;  %v247_v50 = vld [vmem:[%s3676_s29 + $0x8] sm:$0xff]  ;;  %v248_v58 = vld [vmem:[%s3676_s29 + $0x10] sm:$0xff]  ;;  %s3293_s27 = smul.u32 56, %s224_s24  ;;  %s2399_s18 = ssub.s32 (%p3560_p4), 25, %s3580_s8 }
  0x1b   : > { %v449_v39 = vand.u32 4294901760, %v448_v31  ;;  %v461_v40 = vand.u32 4294901760, %v460_v32  ;;  %v455_v41 = vand.u32 4294901760, %v454_v33  ;;  %v478_v42 = vsub.f32 %v3655_v26, %v477_v34  ;;  %v249_v61 = vld [vmem:[%s3676_s29 + $0x18] sm:$0xff]  ;;  %v250_v1 = vld [vmem:[%s3676_s29 + $0x20] sm:$0xff]  ;;  %p2400_p8 = scmp.lt.s32.totalorder (%p3560_p4), %s2399_s18, 7 }
  0x1c   : > { %v467_v43 = vand.u32 4294901760, %v466_v35  ;;  %v473_v44 = vand.u32 4294901760, %v472_v36  ;;  %v485_v45 = vand.u32 4294901760, %v484_v37  ;;  %v490_v46 = vsub.f32 %v3663_v30, %v489_v38  ;;  %s4740_s28 = scalar_lea.vmem [#allocation2], %s3293_s27  }
  0x1d   : > { %v2977_v48 = vpack.c.bf16 %v461_v40, %v449_v39  ;;  %v479_v49 = vand.u32 4294901760, %v478_v42  ;;  %v275_v54 = vsel %vm273_vm0, %v246_v47, 0  ;;  %v278_v56 = vsel %vm273_vm0, %v247_v50, 0  ;;  %v1162_v40 = vld [vmem:[%s4821_s3 + $0x80] sm:$0xff] }
  0x1e   : > { %v2979_v51 = vpack.c.bf16 %v467_v43, %v455_v41  ;;  %v2981_v52 = vpack.c.bf16 %v485_v45, %v473_v44  ;;  %v491_v53 = vand.u32 4294901760, %v490_v46  ;;  %v2985_v57 = vpack.c.bf16 %v3624_v16, %v3619_v15  ;;  %v1163_v41 = vld [vmem:[%s4821_s3 + $0x88] sm:$0xff]  ;;  %v1146_v42 = vld [vmem:[%s4821_s3] sm:$0xff]  ;;  %v1168_v15 = vld [vmem:[%s4821_s3 + $0xb0] sm:$0xff] }
  0x1f   : > { %2978 = vmatprep.subr.bf16.mxu0 %v2977_v48  ;;  %v3691_v59 = vand.u32 4294901760, %v275_v54  ;;  %v3693_v60 = vand.u32 4294901760, %v278_v56  ;;  %v3700_v62 = vpack.c.bf16 %v299_v4, %v295_v3  ;;  %v2987_v31 = vpack.c.bf16 %v3635_v19, %v3629_v17  ;;  %v1147_v46 = vld [vmem:[%s4821_s3 + $0x8] sm:$0xff]  ;;  %v1164_v48 = vld [vmem:[%s4821_s3 + $0x90] sm:$0xff]  ;;  %v1169_v16 = vld [vmem:[%s4821_s3 + $0xb8] sm:$0xff] }
  0x20   : > { %2980 = vmatpush1.bf16.msra.mxu0 %v2979_v51  ;;  %v2983_v55 = vpack.c.bf16 %v491_v53, %v479_v49  ;;  %v281_v32 = vsel %vm273_vm0, %v248_v58, 0  ;;  %v3712_v33 = vpack.c.bf16 %v301_v10, %v297_v6  ;;  %v2989_v0 = vpack.c.bf16 %v3645_v21, %v3640_v20  ;;  %v251_v21 = vld [vmem:[%s3676_s29 + $0x28] sm:$0xff]  ;;  %v1165_v49 = vld [vmem:[%s4821_s3 + $0x98] sm:$0xff] }
  0x21   : > { %2982 = vmatprep.subr.bf16.mxu0 %v2981_v52  ;;  %v3703_v63 = vsub.f32 %v275_v54, %v3691_v59  ;;  %v3718_v3 = vsub.f32 %v278_v56, %v3693_v60  ;;  %v3724_v4 = vpack.c.bf16 %v307_v12, %v303_v11  ;;  %2970 = vmatprep.subr.bf16.mxu1 %v3700_v62  ;;  %v284_v2 = vsel %vm273_vm0, %v249_v61, 0  ;;  %v1148_v54 = vld [vmem:[%s4821_s3 + $0x10] sm:$0xff] }
  0x22   : > { %v3729_v6 = vpack.c.bf16 %v465_v27, %v453_v25  ;;  %2972 = vmatpush1.bf16.msra.mxu1 %v3712_v33  ;;  %v3733_v10 = vand.u32 4294901760, %v281_v32  ;;  %v3736_v8 = vpack.c.bf16 %v483_v29, %v471_v28  ;;  %v3738_v11 = vpack.c.bf16 %v489_v38, %v477_v34  ;;  %v252_v28 = vld [vmem:[%s3676_s29 + $0x30] sm:$0xff]  ;;  %s2650_s29 = smul.u32 (%p3560_p4), 56, %s3548_s21 }
  0x23   : > { %v370_v5 = vand.u32 4294901760, %v3703_v63  ;;  %v381_v7 = vand.u32 4294901760, %v3718_v3  ;;  %2974 = vmatprep.subr.bf16.mxu1 %v3724_v4  ;;  %v2991_v12 = vpack.c.bf16 %v3663_v30, %v3655_v26  ;;  %v287_v17 = vsel %vm273_vm0, %v250_v1, 0 }
  0x24   : > { %2984 = vmatpush1.bf16.msra.mxu0 %v2983_v55  ;;  %v3749_v19 = vpack.c.bf16 %v309_v22, %v305_v18  ;;  %v3756_v25 = vsub.f32 %v281_v32, %v3733_v10  ;;  %v3761_v27 = vand.u32 4294901760, %v284_v2  ;;  %v3765_v14 = vand.u32 4294901760, %v287_v17  ;;  %v1149_v55 = vld [vmem:[%s4821_s3 + $0x18] sm:$0xff]  ;;  %v1167_v32 = vld [vmem:[%s4821_s3 + $0xa8] sm:$0xff]  ;;  %s4769_s7 = scalar_lea.vmem (%p3560_p4), %s4823_s5, %s2650_s29  }
  0x25   : > { %2986 = vmatprep.subr.bf16.mxu0 %v2985_v57  ;;  %v371_v20 = vsub.f32 %v3703_v63, %v370_v5  ;;  %v382_v26 = vsub.f32 %v3718_v3, %v381_v7  ;;  %v290_v22 = vsel %vm273_vm0, %v251_v21, 0  ;;  %v293_v38 = vsel %vm273_vm0, %v252_v28, 0 }
  0x26   : > { %2976 = vmatpush1.bf16.msra.mxu1 %v3749_v19  ;;  %v392_v18 = vand.u32 4294901760, %v3756_v25  ;;  %v3772_v29 = vsub.f32 %v284_v2, %v3761_v27  ;;  %v3776_v30 = vsub.f32 %v287_v17, %v3765_v14  ;;  %v3784_v37 = vand.u32 4294901760, %v290_v22  ;;  %v1150_v17 = vld [vmem:[%s4821_s3 + $0x20] sm:$0xff] }
  0x27   : > { %551 = vmatmul.mubr.f32.vlgmr.msra.gmra.mrb[0].mxu0 %v3691_v59  ;;  %v372_v13 = vand.u32 4294901760, %v371_v20  ;;  %v383_v34 = vand.u32 4294901760, %v382_v26  ;;  %v1234_v44 = vand.u32 4294901760, %v1162_v40  ;;  %v1237_v45 = vand.u32 4294901760, %v1163_v41  ;;  %v1151_v20 = vld [vmem:[%s4821_s3 + $0x28] sm:$0xff] }
  0x28   : > { %2988 = vmatpush1.bf16.msra.mxu0 %v2987_v31  ;;  %556 = vmatprep.mubr.f32.mxu0 %v3504_v9  ;;  %v393_v35 = vsub.f32 %v3756_v25, %v392_v18  ;;  %v403_v36 = vand.u32 4294901760, %v3772_v29  ;;  %v414_v39 = vand.u32 4294901760, %v3776_v30  ;;  %v1186_v47 = vand.u32 4294901760, %v1146_v42  ;;  %v1166_v31 = vld [vmem:[%s4821_s3 + $0xa0] sm:$0xff] }
  0x29   : > { %2990 = vmatprep.subr.bf16.mxu0 %v2989_v0  ;;  %373 = vmatmul.mubr.f32.vlgmr.msra.gmra.mrb[0].mxu1 %v372_v13  ;;  %v1189_v51 = vand.u32 4294901760, %v1147_v46  ;;  %v1240_v52 = vand.u32 4294901760, %v1164_v48  ;;  %v1243_v53 = vand.u32 4294901760, %v1165_v49  ;;  %v3817_v56 = vpack.c.bf16 %v1237_v45, %v1234_v44 }
  0x2a   : > { %378 = vmatprep.mubr.f32.mxu1 %v3504_v9  ;;  %v404_v43 = vsub.f32 %v3772_v29, %v403_v36  ;;  %v394_v50 = vand.u32 4294901760, %v393_v35  ;;  %v3819_v57 = vsub.f32 %v1162_v40, %v1234_v44  ;;  %v3821_v58 = vsub.f32 %v1163_v41, %v1237_v45 }
  0x2b   : > { %558 = vmatmul.mubr.f32.gmra.mrb[2].mxu0 %v3693_v60  ;;  %4917 = vst [vmem:[#allocation3_spill] sm:$0xff] %v3817_v56  ;;  %v3823_v61 = vsub.f32 %v1146_v42, %v1186_v47  ;;  %v3833_v0 = vsub.f32 %v290_v22, %v3784_v37  ;;  %v415_v1 = vsub.f32 %v3776_v30, %v414_v39  ;;  %v1192_v13 = vand.u32 4294901760, %v1148_v54 }
  0x2c   : > { %563 = vmatprep.mubr.f32.mxu0 %v3504_v9  ;;  %2992 = vmatpush1.bf16.msra.mxu0 %v2991_v12  ;;  %v3838_v2 = vsub.f32 %v1147_v46, %v1189_v51  ;;  %v3840_v12 = vsub.f32 %v1164_v48, %v1240_v52  ;;  %v3849_v21 = vpack.c.bf16 %v1189_v51, %v1186_v47  ;;  %v1195_v22 = vand.u32 4294901760, %v1149_v55 }
  0x2d   : > { %2994 = vmatprep.subr.bf16.mxu0 %v3700_v62  ;;  %384 = vmatmul.mubr.f32.gmra.mrb[2].mxu1 %v383_v34  ;;  %v3851_v26 = vsub.f32 %v1165_v49, %v1243_v53  ;;  %v405_v28 = vand.u32 4294901760, %v404_v43  ;;  %v3854_v34 = vpack.c.bf16 %v1243_v53, %v1240_v52  ;;  %v1246_v35 = vand.u32 4294901760, %v1166_v31 }
  0x2e   : > { %389 = vmatprep.mubr.f32.mxu1 %v3504_v9  ;;  %4918 = vst [vmem:[#allocation4_spill] sm:$0xff] %v3849_v21  ;;  %3018 = vmatprep.subr.bf16.mxu1 %v3817_v56  ;;  %v1249_v40 = vand.u32 4294901760, %v1167_v32  ;;  %v3857_v41 = vsub.f32 %v1148_v54, %v1192_v13  ;;  %v3859_v42 = vsub.f32 %v1149_v55, %v1195_v22  ;;  %v1198_v44 = vand.u32 4294901760, %v1150_v17 }
  0x2f   : > { %565 = vmatmul.mubr.f32.gmra.mrb[4].mxu0 %v3733_v10  ;;  %4919 = vst [vmem:[#allocation5_spill] sm:$0xff] %v3854_v34  ;;  %3020 = vmatpush3.bf16.msra.mxu1 %v3849_v21  ;;  %v1201_v45 = vand.u32 4294901760, %v1151_v20  ;;  %v3863_v46 = vand.u32 4294901760, %v293_v38  ;;  %v425_v43 = vand.u32 4294901760, %v3833_v0  ;;  %v3866_v47 = vsub.f32 %v1166_v31, %v1246_v35 }
  0x30   : > { %570 = vmatprep.mubr.f32.mxu0 %v3504_v9  ;;  %v3868_v48 = vsub.f32 %v1167_v32, %v1249_v40  ;;  %v3871_v49 = vpack.c.bf16 %v1195_v22, %v1192_v13  ;;  %3022 = vmatprep.subr.bf16.mxu1 %v3854_v34  ;;  %v416_v53 = vand.u32 4294901760, %v415_v1  ;;  %v3882_v55 = vpack.c.bf16 %v1249_v40, %v1246_v35  ;;  %v1157_v13 = vld [vmem:[%s4821_s3 + $0x58] sm:$0xff] }
  0x31   : > { %395 = vmatmul.mubr.f32.gmra.mrb[4].mxu1 %v394_v50  ;;  %v3873_v50 = vsub.f32 %v1150_v17, %v1198_v44  ;;  %v3875_v51 = vsub.f32 %v1151_v20, %v1201_v45  ;;  %v435_v52 = vsub.f32 %v293_v38, %v3863_v46  ;;  %v426_v54 = vsub.f32 %v3833_v0, %v425_v43 }
  0x32   : > { %400 = vmatprep.mubr.f32.mxu1 %v3504_v9  ;;  %4920 = vst [vmem:[#allocation6_spill] sm:$0xff] %v3871_v49  ;;  %4921 = vst [vmem:[#allocation7_spill] sm:$0xff] %v3882_v55  ;;  %v3889_v38 = vpack.c.bf16 %v1201_v45, %v1198_v44  ;;  %v3001_v20 = vpack.c.bf16 %v459_v24, %v447_v23  ;;  %v1252_v23 = vand.u32 4294901760, %v1168_v15  ;;  %v1255_v24 = vand.u32 4294901760, %v1169_v16  ;;  %v1174_v44 = vld [vmem:[%s4821_s3 + $0xe0] sm:$0xff]  ;;  %v1175_v45 = vld [vmem:[%s4821_s3 + $0xe8] sm:$0xff] }
  0x33   : > { %572 = vmatmul.mubr.f32.gmra.mrb[6].mxu0 %v3761_v27  ;;  %3024 = vmatpush3.bf16.msra.mxu1 %v3871_v49  ;;  %v436_v31 = vand.u32 4294901760, %v435_v52  ;;  %v427_v32 = vand.u32 4294901760, %v426_v54  ;;  %vm2383_vm1 = vcmask 64512  }
  0x34   : > { %577 = vmatprep.mubr.f32.mxu0 %v3504_v9  ;;  %3026 = vmatprep.subr.bf16.mxu1 %v3882_v55  ;;  %4922 = vst [vmem:[#allocation8_spill] sm:$0xff] %v3889_v38 }
  0x35   : > { %406 = vmatmul.mubr.f32.gmra.mrb[6].mxu1 %v405_v28  ;;  %v437_v1 = vsub.f32 %v435_v52, %v436_v31  ;;  %v1219_v28 = vand.u32 4294901760, %v1157_v13 }
  0x36   : > { %411 = vmatprep.mubr.f32.mxu1 %v3504_v9 }
  0x37   : > { %579 = vmatmul.mubr.f32.gmra.mrb[8].mxu0 %v3765_v14  ;;  %3028 = vmatpush3.bf16.msra.mxu1 %v3889_v38  ;;  %v438_v17 = vand.u32 4294901760, %v437_v1 }
  0x38   : > { %584 = vmatprep.mubr.f32.mxu0 %v3504_v9 }
  0x39   : > { %417 = vmatmul.mubr.f32.gmra.mrb[8].mxu1 %v416_v53  ;;  %v1159_v53 = vld [vmem:[%s4821_s3 + $0x68] sm:$0xff] }
  0x3a   : > { %422 = vmatprep.mubr.f32.mxu1 %v3504_v9 }
  0x3b   : > { %586 = vmatmul.mubr.f32.gmra.mrb[10].mxu0 %v3784_v37 }
  0x3c   : > { %591 = vmatprep.mubr.f32.mxu0 %v3504_v9 }
  0x3d   : > { %428 = vmatmul.mubr.f32.gmra.mrb[10].mxu1 %v427_v32 }
  0x3e   : > { %433 = vmatprep.mubr.f32.mxu1 %v3504_v9 }
  0x3f   : > { %593 = vmatmul.mubr.f32.gmra.mrb[12].mxu0 %v3863_v46 }
  0x40   : > { %679 = vmatprep.mubr.f32.mxu0 %v3504_v9 }
  0x41   : > { %439 = vmatmul.mubr.f32.gmra.mrb[12].mxu1 %v438_v17  ;;  %v1176_v17 = vld [vmem:[%s4821_s3 + $0xf0] sm:$0xff] }
  0x43   : > { %682 = vmatmul.mubr.f32.vlgmr.msra.gmra.mrb[0].mxu0 %v3703_v63  ;;  %v1153_v63 = vld [vmem:[%s4821_s3 + $0x38] sm:$0xff] }
  0x44   : > { %2996 = vmatpush1.bf16.msra.mxu0 %v3712_v33  ;;  %687 = vmatprep.mubr.f32.mxu0 %v3504_v9 }
  0x45   : > { %2998 = vmatprep.subr.bf16.mxu0 %v3724_v4 }
  0x47   : > { %690 = vmatmul.mubr.f32.gmra.mrb[2].mxu0 %v3718_v3  ;;  %v1207_v3 = vand.u32 4294901760, %v1153_v63 }
  0x48   : > { %695 = vmatprep.mubr.f32.mxu0 %v3504_v9  ;;  %3000 = vmatpush1.bf16.msra.mxu0 %v3749_v19 }
  0x49   : > { %3002 = vmatprep.subr.bf16.mxu0 %v3001_v20  ;;  %v1177_v20 = vld [vmem:[%s4821_s3 + $0xf8] sm:$0xff] }
  0x4b   : > { %698 = vmatmul.mubr.f32.gmra.mrb[4].mxu0 %v3756_v25  ;;  %v1154_v25 = vld [vmem:[%s4821_s3 + $0x40] sm:$0xff] }
  0x4c   : > { %703 = vmatprep.mubr.f32.mxu0 %v3504_v9 }
  0x4f   : > { %706 = vmatmul.mubr.f32.gmra.mrb[6].mxu0 %v3772_v29 }
  0x50   : > { %711 = vmatprep.mubr.f32.mxu0 %v3504_v9 }
  0x53   : > { %714 = vmatmul.mubr.f32.gmra.mrb[8].mxu0 %v3776_v30  ;;  %v1172_v30 = vld [vmem:[%s4821_s3 + $0xd0] sm:$0xff] }
  0x54   : > { %719 = vmatprep.mubr.f32.mxu0 %v3504_v9 }
  0x57   : > { %722 = vmatmul.mubr.f32.gmra.mrb[10].mxu0 %v3833_v0  ;;  %v1156_v0 = vld [vmem:[%s4821_s3 + $0x50] sm:$0xff] }
  0x58   : > { %727 = vmatprep.mubr.f32.mxu0 %v3504_v9  ;;  %v1216_v22 = vand.u32 4294901760, %v1156_v0 }
  0x5a   : > { %v4037_v40 = vpack.c.bf16 %v1219_v28, %v1216_v22 }
  0x5b   : > { %730 = vmatmul.mubr.f32.gmra.mrb[12].mxu0 %v435_v52  ;;  %v1158_v52 = vld [vmem:[%s4821_s3 + $0x60] sm:$0xff] }
  0x5c   : > { %808 = vmatprep.mubr.f32.mxu0 %v3504_v9  ;;  %4928 = vst [vmem:[#allocation14_spill] sm:$0xff] %v4037_v40  ;;  %v1222_v54 = vand.u32 4294901760, %v1158_v52 }
  0x5f   : > { %812 = vmatmul.mubr.f32.vlgmr.msra.gmra.mrb[0].mxu0 %v370_v5  ;;  %v3963_v5 = vsub.f32 %v1168_v15, %v1252_v23  ;;  %v1276_v15 = vand.u32 4294901760, %v1176_v17 }
  0x60   : > { %3004 = vmatpush1.bf16.msra.mxu0 %v3729_v6  ;;  %817 = vmatprep.mubr.f32.mxu0 %v3504_v9  ;;  %v3965_v6 = vsub.f32 %v1169_v16, %v1255_v24  ;;  %v1279_v16 = vand.u32 4294901760, %v1177_v20 }
  0x61   : > { %3006 = vmatprep.subr.bf16.mxu0 %v3736_v8 }
  0x63   : > { %821 = vmatmul.mubr.f32.gmra.mrb[2].mxu0 %v381_v7 }
  0x64   : > { %826 = vmatprep.mubr.f32.mxu0 %v3504_v9  ;;  %3008 = vmatpush1.bf16.msra.mxu0 %v3738_v11  ;;  %v3971_v11 = vsub.f32 %v1153_v63, %v1207_v3 }
  0x65   : > { %3010 = vmatprep.subr.bf16.mxu0 %v3700_v62  ;;  %v1152_v62 = vld [vmem:[%s4821_s3 + $0x30] sm:$0xff] }
  0x67   : > { %830 = vmatmul.mubr.f32.gmra.mrb[4].mxu0 %v392_v18 }
  0x68   : > { %835 = vmatprep.mubr.f32.mxu0 %v3504_v9 }
  0x6b   : > { %839 = vmatmul.mubr.f32.gmra.mrb[6].mxu0 %v403_v36  ;;  %v1173_v36 = vld [vmem:[%s4821_s3 + $0xd8] sm:$0xff] }
  0x6c   : > { %844 = vmatprep.mubr.f32.mxu0 %v3504_v9 }
  0x6f   : > { %848 = vmatmul.mubr.f32.gmra.mrb[8].mxu0 %v414_v39  ;;  %v1267_v39 = vand.u32 4294901760, %v1173_v36 }
  0x70   : > { %853 = vmatprep.mubr.f32.mxu0 %v3504_v9 }
  0x73   : > { %857 = vmatmul.mubr.f32.gmra.mrb[10].mxu0 %v425_v43  ;;  %v1273_v43 = vand.u32 4294901760, %v1175_v45 }
  0x74   : > { %862 = vmatprep.mubr.f32.mxu0 %v3504_v9 }
  0x77   : > { %866 = vmatmul.mubr.f32.gmra.mrb[12].mxu0 %v436_v31  ;;  %v1225_v31 = vand.u32 4294901760, %v1159_v53 }
  0x78   : > { %960 = vmatprep.mubr.f32.mxu0 %v3504_v9 }
  0x79   : > { %v4057_v1 = vpack.c.bf16 %v1225_v31, %v1222_v54 }
  0x7b   : > { %962 = vmatmul.mubr.f32.vlgmr.msra.gmra.mrb[0].mxu0 %v3691_v59  ;;  %4930 = vst [vmem:[#allocation16_spill] sm:$0xff] %v4057_v1 }
  0x7c   : > { %3012 = vmatpush1.bf16.msra.mxu0 %v3712_v33  ;;  %967 = vmatprep.mubr.f32.mxu0 %v3504_v9  ;;  %v1204_v33 = vand.u32 4294901760, %v1152_v62 }
  0x7d   : > { %3014 = vmatprep.subr.bf16.mxu0 %v3724_v4  ;;  %v3961_v4 = vpack.c.bf16 %v1255_v24, %v1252_v23  ;;  %v1160_v23 = vld [vmem:[%s4821_s3 + $0x70] sm:$0xff]  ;;  %v1161_v24 = vld [vmem:[%s4821_s3 + $0x78] sm:$0xff] }
  0x7e   : > { %v3967_v7 = vpack.c.bf16 %v1207_v3, %v1204_v33  ;;  %v3969_v8 = vsub.f32 %v1152_v62, %v1204_v33  ;;  %v1228_v62 = vand.u32 4294901760, %v1160_v23  ;;  %v1231_v63 = vand.u32 4294901760, %v1161_v24 }
  0x7f   : > { %969 = vmatmul.mubr.f32.gmra.mrb[2].mxu0 %v3693_v60  ;;  %4923 = vst [vmem:[#allocation9_spill] sm:$0xff] %v3961_v4  ;;  %3030 = vmatprep.subr.bf16.mxu1 %v3961_v4  ;;  %v4075_v33 = vpack.c.bf16 %v1279_v16, %v1276_v15 }
  0x80   : > { %974 = vmatprep.mubr.f32.mxu0 %v3504_v9  ;;  %3016 = vmatpush1.bf16.msra.mxu0 %v3749_v19  ;;  %4924 = vst [vmem:[#allocation10_spill] sm:$0xff] %v3967_v7  ;;  %v4077_v3 = vpack.c.bf16 %v1231_v63, %v1228_v62 }
  0x81   : > { %3178 = vmatprep.subr.bf16.mxu0 %v3817_v56  ;;  %3032 = vmatpush3.bf16.msra.mxu1 %v3967_v7  ;;  %4931 = vst [vmem:[#allocation17_spill] sm:$0xff] %v4075_v33 }
  0x82   : > { %4932 = vst [vmem:[#allocation18_spill] sm:$0xff] %v4077_v3 }
  0x83   : > { %976 = vmatmul.mubr.f32.gmra.mrb[4].mxu0 %v3733_v10 }
  0x84   : > { %981 = vmatprep.mubr.f32.mxu0 %v3504_v9 }
  0x87   : > { %983 = vmatmul.mubr.f32.gmra.mrb[6].mxu0 %v3761_v27 }
  0x88   : > { %988 = vmatprep.mubr.f32.mxu0 %v3504_v9 }
  0x8b   : > { %990 = vmatmul.mubr.f32.gmra.mrb[8].mxu0 %v3765_v14 }
  0x8c   : > { %995 = vmatprep.mubr.f32.mxu0 %v3504_v9 }
  0x8f   : > { %997 = vmatmul.mubr.f32.gmra.mrb[10].mxu0 %v3784_v37 }
  0x90   : > { %1002 = vmatprep.mubr.f32.mxu0 %v3504_v9 }
  0x93   : > { %1004 = vmatmul.mubr.f32.gmra.mrb[12].mxu0 %v3863_v46 }
  0x94   : > { %1082 = vmatprep.mubr.f32.mxu0 %v3504_v9 }
  0x97   : > { %1084 = vmatmul.mubr.f32.vlgmr.msra.gmra.mrb[0].mxu0 %v3691_v59  ;;  %v1170_v59 = vld [vmem:[%s4821_s3 + $0xc0] sm:$0xff] }
  0x98   : > { %1089 = vmatprep.mubr.f32.mxu0 %v3504_v9  ;;  %3180 = vmatpush3.bf16.msra.mxu0 %v3849_v21 }
  0x99   : > { %3182 = vmatprep.subr.bf16.mxu0 %v3854_v34 }
  0x9b   : > { %1091 = vmatmul.mubr.f32.gmra.mrb[2].mxu0 %v3693_v60  ;;  %v1171_v60 = vld [vmem:[%s4821_s3 + $0xc8] sm:$0xff] }
  0x9c   : > { %1096 = vmatprep.mubr.f32.mxu0 %v3504_v9  ;;  %3184 = vmatpush3.bf16.msra.mxu0 %v3871_v49  ;;  %v1261_v19 = vand.u32 4294901760, %v1171_v60 }
  0x9d   : > { %3186 = vmatprep.subr.bf16.mxu0 %v3882_v55 }
  0x9f   : > { %1098 = vmatmul.mubr.f32.gmra.mrb[4].mxu0 %v3733_v10  ;;  %v1258_v10 = vand.u32 4294901760, %v1170_v59 }
  0xa0   : > { %1103 = vmatprep.mubr.f32.mxu0 %v3504_v9  ;;  %3188 = vmatpush3.bf16.msra.mxu0 %v3889_v38  ;;  %v4101_v38 = vsub.f32 %v1175_v45, %v1273_v43  ;;  %v4835_v45 = vand.u32 4294901760, %v3851_v26 }
  0xa1   : > { %3190 = vmatprep.subr.bf16.mxu0 %v3961_v4  ;;  %v4015_v18 = vpack.c.bf16 %v1261_v19, %v1258_v10  ;;  %v4097_v4 = vsub.f32 %v1157_v13, %v1219_v28 }
  0xa3   : > { %1105 = vmatmul.mubr.f32.gmra.mrb[6].mxu0 %v3761_v27  ;;  %v1210_v27 = vand.u32 4294901760, %v1154_v25  ;;  %4925 = vst [vmem:[#allocation11_spill] sm:$0xff] %v4015_v18  ;;  %3034 = vmatprep.subr.bf16.mxu1 %v4015_v18 }
  0xa4   : > { %1110 = vmatprep.mubr.f32.mxu0 %v3504_v9  ;;  %3192 = vmatpush3.bf16.msra.mxu0 %v3967_v7  ;;  %v4095_v7 = vsub.f32 %v1156_v0, %v1216_v22 }
  0xa5   : > { %3194 = vmatprep.subr.bf16.mxu0 %v4015_v18  ;;  %v4093_v18 = vsub.f32 %v1173_v36, %v1267_v39  ;;  %v4840_v36 = vand.u32 4294901760, %v3838_v2 }
  0xa7   : > { %1112 = vmatmul.mubr.f32.gmra.mrb[8].mxu0 %v3765_v14  ;;  %v1398_v22 = vsub.f32 %v3838_v2, %v4840_v36 }
  0xa8   : > { %1117 = vmatprep.mubr.f32.mxu0 %v3504_v9 }
  0xab   : > { %1119 = vmatmul.mubr.f32.gmra.mrb[10].mxu0 %v3784_v37  ;;  %v1264_v37 = vand.u32 4294901760, %v1172_v30 }
  0xac   : > { %1124 = vmatprep.mubr.f32.mxu0 %v3504_v9  ;;  %v1155_v9 = vld [vmem:[%s4821_s3 + $0x48] sm:$0xff] }
  0xad   : > { %v1213_v14 = vand.u32 4294901760, %v1155_v9  ;;  %v4035_v35 = vpack.c.bf16 %v1267_v39, %v1264_v37 }
  0xaf   : > { %1126 = vmatmul.mubr.f32.gmra.mrb[12].mxu0 %v3863_v46  ;;  %v4017_v29 = vpack.c.bf16 %v1213_v14, %v1210_v27  ;;  %4927 = vst [vmem:[#allocation13_spill] sm:$0xff] %v4035_v35  ;;  %v1270_v46 = vand.u32 4294901760, %v1174_v44 }
  0xb1   : > { %4926 = vst [vmem:[#allocation12_spill] sm:$0xff] %v4017_v29  ;;  %3196 = vmatpush3.bf16.msra.mxu0 %v4017_v29  ;;  %3036 = vmatpush3.bf16.msra.mxu1 %v4017_v29  ;;  %v4055_v32 = vpack.c.bf16 %v1273_v43, %v1270_v46  ;;  %v4089_v29 = vsub.f32 %v1155_v9, %v1213_v14  ;;  %v4843_v14 = vand.u32 4294901760, %v3821_v58 }
  0xb2   : > { %3198 = vmatprep.subr.bf16.mxu0 %v4035_v35  ;;  %3038 = vmatprep.subr.bf16.mxu1 %v4035_v35  ;;  %v4087_v35 = vsub.f32 %v1154_v25, %v1210_v27  ;;  %v4111_v25 = vsub.f32 %v1160_v23, %v1228_v62  ;;  %v4113_v9 = vsub.f32 %v1161_v24, %v1231_v63  ;;  %v4844_v27 = vand.u32 4294901760, %v3819_v57 }
  0xb3   : > { %4929 = vst [vmem:[#allocation15_spill] sm:$0xff] %v4055_v32  ;;  %v1510_v0 = vsub.f32 %v3821_v58, %v4843_v14  ;;  %v4836_v23 = vand.u32 4294901760, %v3859_v42  ;;  %v4839_v24 = vand.u32 4294901760, %v3866_v47  ;;  %v4838_v62 = vand.u32 4294901760, %v3868_v48 }
  0xb4   : > { %4934 = vst [vmem:[#allocation20_spill] sm:$0xff] %v4111_v25  ;;  %4935 = vst [vmem:[#allocation21_spill] sm:$0xff] %v4113_v9  ;;  %v1503_v39 = vsub.f32 %v3819_v57, %v4844_v27 }
  0xb5   : > { %3200 = vmatpush3.bf16.msra.mxu0 %v4037_v40  ;;  %3040 = vmatpush3.bf16.msra.mxu1 %v4037_v40  ;;  %v4083_v40 = vsub.f32 %v1170_v59, %v1258_v10  ;;  %v4103_v59 = vsub.f32 %v1158_v52, %v1222_v54  ;;  %v4107_v10 = vsub.f32 %v1176_v17, %v1276_v15  ;;  %v1511_v52 = vand.u32 4294901760, %v1510_v0 }
  0xb6   : > { %3202 = vmatprep.subr.bf16.mxu0 %v4055_v32  ;;  %3042 = vmatprep.subr.bf16.mxu1 %v4055_v32  ;;  %v4085_v32 = vsub.f32 %v1171_v60, %v1261_v19  ;;  %v4105_v60 = vsub.f32 %v1159_v53, %v1225_v31  ;;  %v4109_v19 = vsub.f32 %v1177_v20, %v1279_v16  ;;  %v1504_v43 = vand.u32 4294901760, %v1503_v39 }
  0xb7   : > { %4933 = vst [vmem:[#allocation19_spill] sm:$0xff] %v4107_v10  ;;  %v1399_v54 = vand.u32 4294901760, %v1398_v22  ;;  %v1524_v17 = vsub.f32 %v3851_v26, %v4835_v45  ;;  %v1538_v45 = vsub.f32 %v3868_v48, %v4838_v62 }
  0xb8   : > { %v3049_v16 = vpack.c.bf16 %v1511_v52, %v1504_v43  ;;  %v1531_v43 = vsub.f32 %v3866_v47, %v4839_v24 }
  0xb9   : > { %3204 = vmatpush3.bf16.msra.mxu0 %v4057_v1  ;;  %3044 = vmatpush3.bf16.msra.mxu1 %v4057_v1  ;;  %v4091_v1 = vsub.f32 %v1172_v30, %v1264_v37  ;;  %v4841_v30 = vand.u32 4294901760, %v3823_v61 }
  0xba   : > { %3206 = vmatprep.subr.bf16.mxu0 %v4075_v33  ;;  %3046 = vmatprep.subr.bf16.mxu1 %v4075_v33  ;;  %v4099_v33 = vsub.f32 %v1174_v44, %v1270_v46  ;;  %v4837_v44 = vand.u32 4294901760, %v3840_v12  ;;  %v4834_v46 = vand.u32 4294901760, %v3857_v41 }
  0xbb   : > { %v1391_v13 = vsub.f32 %v3823_v61, %v4841_v30  ;;  %v4860_v55 = vand.u32 4294901760, %v4091_v1 }
  0xbc   : > { %v1517_v31 = vsub.f32 %v3840_v12, %v4837_v44  ;;  %v1405_v20 = vsub.f32 %v3857_v41, %v4834_v46  ;;  %v1412_v46 = vsub.f32 %v3859_v42, %v4836_v23  ;;  %v4849_v23 = vand.u32 4294901760, %v3965_v6 }
  0xbd   : > { %3208 = vmatpush3.bf16.msra.mxu0 %v4077_v3  ;;  %3048 = vmatpush3.bf16.msra.mxu1 %v4077_v3  ;;  %v1392_v53 = vand.u32 4294901760, %v1391_v13  ;;  %v1525_v13 = vand.u32 4294901760, %v1524_v17 }
  0xbe   : > { %v1518_v0 = vand.u32 4294901760, %v1517_v31  ;;  %3050 = vmatprep.subr.bf16.mxu1 %v3049_v16  ;;  %v1406_v22 = vand.u32 4294901760, %v1405_v20  ;;  %v1413_v17 = vand.u32 4294901760, %v1412_v46  ;;  %v1532_v20 = vand.u32 4294901760, %v1531_v43 }
  0xbf   : > { %v4154_v39 = vpack.c.bf16 %v1399_v54, %v1392_v53  ;;  %v4842_v53 = vand.u32 4294901760, %v3873_v50  ;;  %v4845_v54 = vand.u32 4294901760, %v3875_v51  ;;  %v4847_v16 = vand.u32 4294901760, %v3963_v5 }
  0xc0   : > { %v4162_v52 = vpack.c.bf16 %v1525_v13, %v1518_v0  ;;  %v1539_v0 = vand.u32 4294901760, %v1538_v45  ;;  %v4181_v24 = vpack.c.bf16 %v1413_v17, %v1406_v22  ;;  %v1552_v43 = vsub.f32 %v3965_v6, %v4849_v23 }
  0xc1   : > { %4936 = vst [vmem:[#allocation22_spill] sm:$0xff] %v4154_v39  ;;  %v1419_v13 = vsub.f32 %v3873_v50, %v4842_v53  ;;  %v1426_v62 = vsub.f32 %v3875_v51, %v4845_v54  ;;  %v1545_v46 = vsub.f32 %v3963_v5, %v4847_v16  ;;  %v4848_v53 = vand.u32 4294901760, %v3969_v8 }
  0xc2   : > { %4937 = vst [vmem:[#allocation23_spill] sm:$0xff] %v4162_v52  ;;  %4938 = vst [vmem:[#allocation24_spill] sm:$0xff] %v4181_v24  ;;  %v4189_v36 = vpack.c.bf16 %v1539_v0, %v1532_v20  ;;  %v1553_v54 = vand.u32 4294901760, %v1552_v43  ;;  %v4851_v22 = vand.u32 4294901760, %v3971_v11  ;;  %v4853_v17 = vand.u32 4294901760, %v4083_v40 }
  0xc3   : > { %v1420_v45 = vand.u32 4294901760, %v1419_v13  ;;  %v1427_v30 = vand.u32 4294901760, %v1426_v62  ;;  %v1546_v27 = vand.u32 4294901760, %v1545_v46  ;;  %v1433_v20 = vsub.f32 %v3969_v8, %v4848_v53 }
  0xc4   : > { %4939 = vst [vmem:[#allocation25_spill] sm:$0xff] %v4189_v36  ;;  %v4854_v62 = vand.u32 4294901760, %v4085_v32  ;;  %v1440_v13 = vsub.f32 %v3971_v11, %v4851_v22  ;;  %v1559_v46 = vsub.f32 %v4083_v40, %v4853_v17  ;;  %v4859_v53 = vand.u32 4294901760, %v4089_v29 }
  0xc5   : > { %v4198_v16 = vpack.c.bf16 %v1427_v30, %v1420_v45  ;;  %v4204_v0 = vpack.c.bf16 %v1553_v54, %v1546_v27  ;;  %v1434_v43 = vand.u32 4294901760, %v1433_v20  ;;  %v4858_v45 = vand.u32 4294901760, %v4087_v35 }
  0xc6   : > { %v1566_v30 = vsub.f32 %v4085_v32, %v4854_v62  ;;  %v1441_v27 = vand.u32 4294901760, %v1440_v13  ;;  %v1560_v54 = vand.u32 4294901760, %v1559_v46  ;;  %v4862_v22 = vand.u32 4294901760, %v4093_v18 }
  0xc7   : > { %4940 = vst [vmem:[#allocation26_spill] sm:$0xff] %v4198_v16  ;;  %4941 = vst [vmem:[#allocation27_spill] sm:$0xff] %v4204_v0  ;;  %v1447_v20 = vsub.f32 %v4087_v35, %v4858_v45  ;;  %v1454_v62 = vsub.f32 %v4089_v29, %v4859_v53  ;;  %v1573_v13 = vsub.f32 %v4091_v1, %v4860_v55  ;;  %v4861_v45 = vand.u32 4294901760, %v4095_v7 }
  0xc8   : > { %v1567_v17 = vand.u32 4294901760, %v1566_v30  ;;  %v4229_v34 = vpack.c.bf16 %v1441_v27, %v1434_v43  ;;  %v1580_v46 = vsub.f32 %v4093_v18, %v4862_v22  ;;  %v4863_v43 = vand.u32 4294901760, %v4097_v4 }
  0xc9   : > { %v1448_v30 = vand.u32 4294901760, %v1447_v20  ;;  %v1455_v56 = vand.u32 4294901760, %v1454_v62  ;;  %v1574_v16 = vand.u32 4294901760, %v1573_v13  ;;  %v4864_v27 = vand.u32 4294901760, %v4099_v33 }
  0xca   : > { %4942 = vst [vmem:[#allocation28_spill] sm:$0xff] %v4229_v34  ;;  %v4237_v21 = vpack.c.bf16 %v1567_v17, %v1560_v54  ;;  %v1581_v53 = vand.u32 4294901760, %v1580_v46  ;;  %v1461_v17 = vsub.f32 %v4095_v7, %v4861_v45  ;;  %v4865_v62 = vand.u32 4294901760, %v4101_v38 }
  0xcb   : > { %v4246_v55 = vpack.c.bf16 %v1455_v56, %v1448_v30  ;;  %v1468_v20 = vsub.f32 %v4097_v4, %v4863_v43  ;;  %v1587_v13 = vsub.f32 %v4099_v33, %v4864_v27  ;;  %v4866_v30 = vand.u32 4294901760, %v4103_v59 }
  0xcc   : > { %4943 = vst [vmem:[#allocation29_spill] sm:$0xff] %v4237_v21  ;;  %v4252_v54 = vpack.c.bf16 %v1581_v53, %v1574_v16  ;;  %v1462_v46 = vand.u32 4294901760, %v1461_v17  ;;  %v1594_v56 = vsub.f32 %v4101_v38, %v4865_v62  ;;  %v4867_v45 = vand.u32 4294901760, %v4105_v60 }
  0xcd   : > { %4944 = vst [vmem:[#allocation30_spill] sm:$0xff] %v4246_v55  ;;  %v1469_v53 = vand.u32 4294901760, %v1468_v20  ;;  %v1588_v16 = vand.u32 4294901760, %v1587_v13  ;;  %v4871_v43 = vand.u32 4294901760, %v4109_v19  ;;  %v1475_v17 = vsub.f32 %v4103_v59, %v4866_v30 }
  0xce   : > { %4945 = vst [vmem:[#allocation31_spill] sm:$0xff] %v4252_v54  ;;  %v4868_v54 = vand.u32 4294901760, %v4107_v10  ;;  %v1595_v27 = vand.u32 4294901760, %v1594_v56  ;;  %v1482_v62 = vsub.f32 %v4105_v60, %v4867_v45  ;;  %v4870_v30 = vand.u32 4294901760, %v4111_v25 }
  0xcf   : > { %v4277_v21 = vpack.c.bf16 %v1469_v53, %v1462_v46  ;;  %v1608_v13 = vsub.f32 %v4109_v19, %v4871_v43  ;;  %v1476_v56 = vand.u32 4294901760, %v1475_v17  ;;  %v4869_v45 = vand.u32 4294901760, %v4113_v9 }
  0xd0   : > { %v1601_v20 = vsub.f32 %v4107_v10, %v4868_v54  ;;  %v4285_v36 = vpack.c.bf16 %v1595_v27, %v1588_v16  ;;  %v1483_v24 = vand.u32 4294901760, %v1482_v62  ;;  %v1489_v53 = vsub.f32 %v4111_v25, %v4870_v30 }
  0xd1   : > { %v1609_v39 = vand.u32 4294901760, %v1608_v13  ;;  %v1496_v27 = vsub.f32 %v4113_v9, %v4869_v45  ;;  %v261_v45 = vld [vmem:[%s4820_s2] sm:$0x3] }
  0xd2   : > { %v1602_v52 = vand.u32 4294901760, %v1601_v20  ;;  %v4289_v46 = vpack.c.bf16 %v1483_v24, %v1476_v56  ;;  %v1490_v16 = vand.u32 4294901760, %v1489_v53  ;;  %v263_v56 = vlaneseq }
  0xd3   : > { %v1497_v62 = vand.u32 4294901760, %v1496_v27  ;;  %v4968_v10 = vld [vmem:[#allocation29_spill] sm:$0xff] }
  0xd4   : > { %v4294_v54 = vpack.c.bf16 %v1609_v39, %v1602_v52 }
  0xd5   : > { %v4299_v17 = vpack.c.bf16 %v1497_v62, %v1490_v16  ;;  %v264_v62 = vshrl.u32 %v263_v56, 7 }
  0xd7   : > { %v265_v52 = vsub.s32 0, %v264_v62  ;;  %v269_v30 = vsub.s32 1, %v264_v62 }
  0xd9   : > { %v4336_v39 = vrot.slane %v261_v45, %v265_v52  ;;  %v4338_v43 = vrot.slane %v261_v45, %v269_v30 }
  0xfc   : > { %v4119_v37 = vpop.f32.mrb[0].mxu1 }
  0xfd   : > { %v4133_v28 = vpop.f32.mrb[1].mxu1  ;;  %v375_v53 = vadd.f32 %v4119_v37, %v4336_v39 }
  0xfe   : > { %v377_v27 = vadd.f32 %v4133_v28, %v4338_v43 }
 0x100   : > { %v4147_v15 = vpop.f32.mrb[2].mxu1 }
 0x101   : > { %v4152_v63 = vpop.f32.mrb[3].mxu1  ;;  %v386_v56 = vadd.f32 %v4147_v15, %v4336_v39 }
 0x102   : > { %v388_v62 = vadd.f32 %v4152_v63, %v4338_v43 }
 0x104   : > { %v4169_v31 = vpop.f32.mrb[4].mxu1 }
 0x105   : > { %v4173_v44 = vpop.f32.mrb[5].mxu1  ;;  %v397_v37 = vadd.f32 %v4169_v31, %v4336_v39 }
 0x106   : > { %v399_v28 = vadd.f32 %v4173_v44, %v4338_v43 }
 0x108   : > { %v4192_v14 = vpop.f32.mrb[6].mxu1 }
 0x109   : > { %v4196_v3 = vpop.f32.mrb[7].mxu1  ;;  %v408_v63 = vadd.f32 %v4192_v14, %v4336_v39 }
 0x10c   : > { %v4217_v23 = vpop.f32.mrb[8].mxu1 }
 0x10d   : > { %v4221_v49 = vpop.f32.mrb[9].mxu1  ;;  %v419_v44 = vadd.f32 %v4217_v23, %v4336_v39 }
 0x10e   : > { %v421_v14 = vadd.f32 %v4221_v49, %v4338_v43 }
 0x110   : > { %v4240_v0 = vpop.f32.mrb[10].mxu1 }
 0x111   : > { %v4244_v34 = vpop.f32.mrb[11].mxu1  ;;  %v430_v23 = vadd.f32 %v4240_v0, %v4336_v39 }
 0x114   : > { %v4265_v22 = vpop.f32.mrb[12].mxu1 }
 0x115   : > { %v4269_v55 = vpop.f32.mrb[13].mxu1 }
 0x16a   : > { %v1085_v13 = vpop.f32.mrb[0].mxu0 }
 0x16b   : > { %v3210_v16 = vadd.f32 %v1085_v13, %v375_v53  ;;  %v1087_v24 = vpop.f32.mrb[1].mxu0 }
 0x16c   : > { %v3212_v20 = vadd.f32 %v1087_v24, %v377_v27 }
 0x16d   : > { %3384 = vtanh.f32 %v3210_v16 }
 0x16e   : > { %3386 = vtanh.f32 %v3212_v20  ;;  %v1092_v45 = vpop.f32.mrb[2].mxu0  ;;  %v410_v20 = vadd.f32 %v4196_v3, %v4338_v43 }
 0x16f   : > { %v3214_v30 = vadd.f32 %v1092_v45, %v386_v56  ;;  %v1094_v52 = vpop.f32.mrb[3].mxu0 }
 0x170   : > { %v3216_v25 = vadd.f32 %v1094_v52, %v388_v62 }
 0x171   : > { %3388 = vtanh.f32 %v3214_v30 }
 0x172   : > { %3390 = vtanh.f32 %v3216_v25  ;;  %v1099_v13 = vpop.f32.mrb[4].mxu0 }
 0x173   : > { %v3218_v15 = vadd.f32 %v1099_v13, %v397_v37  ;;  %v1101_v24 = vpop.f32.mrb[5].mxu0 }
 0x174   : > { %v3220_v53 = vadd.f32 %v1101_v24, %v399_v28 }
 0x175   : > { %3392 = vtanh.f32 %v3218_v15 }
 0x176   : > { %3394 = vtanh.f32 %v3220_v53  ;;  %v1106_v27 = vpop.f32.mrb[6].mxu0 }
 0x177   : > { %v3385_v31 = vpop.eup %3384  ;;  %v3222_v16 = vadd.f32 %v1106_v27, %v408_v63  ;;  %v1108_v56 = vpop.f32.mrb[7].mxu0  ;;  %v432_v63 = vadd.f32 %v4244_v34, %v4338_v43 }
 0x178   : > { %v3387_v25 = vpop.eup %3386  ;;  %v4358_v62 = vand.u32 4294901760, %v3385_v31  ;;  %v3224_v45 = vadd.f32 %v1108_v56, %v410_v20 }
 0x179   : > { %3396 = vtanh.f32 %v3222_v16  ;;  %v4362_v30 = vand.u32 4294901760, %v3387_v25 }
 0x17a   : > { %v4365_v3 = vsub.f32 %v3385_v31, %v4358_v62  ;;  %3398 = vtanh.f32 %v3224_v45  ;;  %v1113_v52 = vpop.f32.mrb[8].mxu0  ;;  %v441_v45 = vadd.f32 %v4265_v22, %v4336_v39 }
 0x17b   : > { %v3389_v37 = vpop.eup %3388  ;;  %v3226_v28 = vadd.f32 %v1113_v52, %v419_v44  ;;  %v1115_v13 = vpop.f32.mrb[9].mxu0  ;;  %2334 = vmatprep.mubr.f32.mxu0 %v4362_v30  ;;  %v4371_v15 = vsub.f32 %v3387_v25, %v4362_v30 }
 0x17c   : > { %4946 = vst [vmem:[#allocation32_spill] sm:$0xff] %v4365_v3  ;;  %v3391_v49 = vpop.eup %3390  ;;  %v3228_v24 = vadd.f32 %v1115_v13, %v421_v14  ;;  %2336 = vmatmul.mubr.f32.vlgmr.msra.gmra.mrb[14].mxu0 %v4358_v62  ;;  %v4376_v53 = vand.u32 4294901760, %v3389_v37  ;;  %v4874_v20 = vand.u32 4294901760, %v4365_v3 }
 0x17d   : > { %3400 = vtanh.f32 %v3226_v28  ;;  %v4379_v27 = vand.u32 4294901760, %v3391_v49  ;;  %v4875_v31 = vand.u32 4294901760, %v4371_v15 }
 0x17e   : > { %3402 = vtanh.f32 %v3228_v24  ;;  %v1120_v0 = vpop.f32.mrb[10].mxu0  ;;  %v1290_v16 = vsub.f32 %v4365_v3, %v4874_v20  ;;  %v4386_v56 = vsub.f32 %v3389_v37, %v4376_v53  ;;  %v443_v37 = vadd.f32 %v4269_v55, %v4338_v43  ;;  %v4963_v3 = vld [vmem:[#allocation27_spill] sm:$0xff] }
 0x17f   : > { %v3393_v44 = vpop.eup %3392  ;;  %v3230_v34 = vadd.f32 %v1120_v0, %v430_v23  ;;  %v1122_v25 = vpop.f32.mrb[11].mxu0  ;;  %2341 = vmatprep.mubr.f32.mxu0 %v4379_v27  ;;  %v1284_v14 = vsub.f32 %v4371_v15, %v4875_v31  ;;  %v4395_v52 = vsub.f32 %v3391_v49, %v4379_v27 }
 0x180   : > { %4947 = vst [vmem:[#allocation33_spill] sm:$0xff] %v4386_v56  ;;  %v3395_v28 = vpop.eup %3394  ;;  %v3232_v13 = vadd.f32 %v1122_v25, %v432_v63  ;;  %2343 = vmatmul.mubr.f32.gmra.mrb[16].mxu0 %v4376_v53  ;;  %v4400_v23 = vand.u32 4294901760, %v3393_v44  ;;  %v4876_v24 = vand.u32 4294901760, %v4386_v56  ;;  %v1291_v20 = vand.u32 4294901760, %v1290_v16 }
 0x181   : > { %4948 = vst [vmem:[#allocation34_spill] sm:$0xff] %v4395_v52  ;;  %3404 = vtanh.f32 %v3230_v34  ;;  %v1285_v22 = vand.u32 4294901760, %v1284_v14  ;;  %v4403_v39 = vand.u32 4294901760, %v3395_v28  ;;  %v4877_v0 = vand.u32 4294901760, %v4395_v52 }
 0x182   : > { %3406 = vtanh.f32 %v3232_v13  ;;  %v1127_v49 = vpop.f32.mrb[12].mxu0  ;;  %v1305_v63 = vsub.f32 %v4386_v56, %v4876_v24  ;;  %v4410_v25 = vsub.f32 %v3393_v44, %v4400_v23 }
 0x183   : > { %v3397_v55 = vpop.eup %3396  ;;  %v3234_v43 = vadd.f32 %v1127_v49, %v441_v45  ;;  %v1129_v31 = vpop.f32.mrb[13].mxu0  ;;  %1286 = vmatprep.mubr.f32.mxu1 %v1285_v22  ;;  %2348 = vmatprep.mubr.f32.mxu0 %v4403_v39  ;;  %v1299_v34 = vsub.f32 %v4395_v52, %v4877_v0  ;;  %v4417_v14 = vsub.f32 %v3395_v28, %v4403_v39  ;;  %v4951_v22 = vld [vmem:[#allocation22_spill] sm:$0xff]  ;;  %v4952_v28 = vld [vmem:[#allocation23_spill] sm:$0xff] }
 0x184   : > { %4949 = vst [vmem:[#allocation35_spill] sm:$0xff] %v4410_v25  ;;  %v3399_v16 = vpop.eup %3398  ;;  %v3236_v13 = vadd.f32 %v1129_v31, %v443_v37  ;;  %1292 = vmatmul.mubr.f32.vlgmr.msra.gmra.mrb[14].mxu1 %v1291_v20  ;;  %2350 = vmatmul.mubr.f32.gmra.mrb[18].mxu0 %v4400_v23  ;;  %v4420_v44 = vand.u32 4294901760, %v3397_v55  ;;  %v4880_v45 = vand.u32 4294901760, %v4410_v25  ;;  %v1306_v56 = vand.u32 4294901760, %v1305_v63 }
 0x185   : > { %4950 = vst [vmem:[#allocation36_spill] sm:$0xff] %v4417_v14  ;;  %3408 = vtanh.f32 %v3234_v43  ;;  %3052 = vmatpush3.bf16.msra.mxu1 %v4951_v22  ;;  %v1300_v49 = vand.u32 4294901760, %v1299_v34  ;;  %v4424_v24 = vand.u32 4294901760, %v3399_v16  ;;  %v4883_v0 = vand.u32 4294901760, %v4417_v14  ;;  %v4956_v22 = vld [vmem:[#allocation24_spill] sm:$0xff] }
 0x186   : > { %3410 = vtanh.f32 %v3236_v13  ;;  %3054 = vmatprep.subr.bf16.mxu1 %v4952_v28  ;;  %v1320_v20 = vsub.f32 %v4410_v25, %v4880_v45  ;;  %v4432_v31 = vsub.f32 %v3397_v55, %v4420_v44  ;;  %v4958_v25 = vld [vmem:[#allocation25_spill] sm:$0xff] }
 0x187   : > { %v3401_v37 = vpop.eup %3400  ;;  %1301 = vmatprep.mubr.f32.mxu1 %v1300_v49  ;;  %2355 = vmatprep.mubr.f32.mxu0 %v4424_v24  ;;  %v1314_v43 = vsub.f32 %v4417_v14, %v4883_v0  ;;  %v4439_v34 = vsub.f32 %v3399_v16, %v4424_v24 }
 0x188   : > { %4953 = vst [vmem:[#allocation22_spill] sm:$0xff] %v4432_v31  ;;  %v3403_v13 = vpop.eup %3402  ;;  %1307 = vmatmul.mubr.f32.gmra.mrb[16].mxu1 %v1306_v56  ;;  %2357 = vmatmul.mubr.f32.gmra.mrb[20].mxu0 %v4420_v44  ;;  %v4442_v63 = vand.u32 4294901760, %v3401_v37  ;;  %v4886_v55 = vand.u32 4294901760, %v4432_v31  ;;  %v1321_v0 = vand.u32 4294901760, %v1320_v20 }
 0x189   : > { %4954 = vst [vmem:[#allocation23_spill] sm:$0xff] %v4439_v34  ;;  %3056 = vmatpush3.bf16.msra.mxu1 %v4956_v22  ;;  %v1315_v49 = vand.u32 4294901760, %v1314_v43  ;;  %v4446_v28 = vand.u32 4294901760, %v3403_v13  ;;  %v4893_v45 = vand.u32 4294901760, %v4439_v34 }
 0x18a   : > { %4955 = vst [vmem:[#allocation37_spill] sm:$0xff] %v4442_v63  ;;  %3058 = vmatprep.subr.bf16.mxu1 %v4958_v25  ;;  %v1335_v56 = vsub.f32 %v4432_v31, %v4886_v55  ;;  %v4454_v16 = vsub.f32 %v3401_v37, %v4442_v63  ;;  %v4961_v55 = vld [vmem:[#allocation26_spill] sm:$0xff] }
 0x18b   : > { %4957 = vst [vmem:[#allocation24_spill] sm:$0xff] %v4446_v28  ;;  %v3405_v14 = vpop.eup %3404  ;;  %1316 = vmatprep.mubr.f32.mxu1 %v1315_v49  ;;  %2362 = vmatprep.mubr.f32.mxu0 %v4446_v28  ;;  %v1329_v43 = vsub.f32 %v4439_v34, %v4893_v45  ;;  %v4461_v22 = vsub.f32 %v3403_v13, %v4446_v28 }
 0x18c   : > { %4959 = vst [vmem:[#allocation25_spill] sm:$0xff] %v4454_v16  ;;  %v3407_v25 = vpop.eup %3406  ;;  %1322 = vmatmul.mubr.f32.gmra.mrb[18].mxu1 %v1321_v0  ;;  %2364 = vmatmul.mubr.f32.gmra.mrb[22].mxu0 %v4442_v63  ;;  %v4464_v20 = vand.u32 4294901760, %v3405_v14  ;;  %v4896_v37 = vand.u32 4294901760, %v4454_v16  ;;  %v1336_v45 = vand.u32 4294901760, %v1335_v56 }
 0x18d   : > { %3060 = vmatpush3.bf16.msra.mxu1 %v4961_v55  ;;  %v1330_v49 = vand.u32 4294901760, %v1329_v43  ;;  %v4468_v31 = vand.u32 4294901760, %v3407_v25  ;;  %v4903_v52 = vand.u32 4294901760, %v4461_v22 }
 0x18e   : > { %4960 = vst [vmem:[#allocation38_spill] sm:$0xff] %v4464_v20  ;;  %3062 = vmatprep.subr.bf16.mxu1 %v4963_v3  ;;  %v1350_v0 = vsub.f32 %v4454_v16, %v4896_v37  ;;  %v4476_v13 = vsub.f32 %v3405_v14, %v4464_v20  ;;  %v4966_v37 = vld [vmem:[#allocation28_spill] sm:$0xff] }
 0x18f   : > { %4962 = vst [vmem:[#allocation26_spill] sm:$0xff] %v4468_v31  ;;  %v3409_v34 = vpop.eup %3408  ;;  %1331 = vmatprep.mubr.f32.mxu1 %v1330_v49  ;;  %2369 = vmatprep.mubr.f32.mxu0 %v4468_v31  ;;  %v1344_v55 = vsub.f32 %v4461_v22, %v4903_v52  ;;  %v4483_v43 = vsub.f32 %v3407_v25, %v4468_v31 }
 0x190   : > { %4964 = vst [vmem:[#allocation27_spill] sm:$0xff] %v4476_v13  ;;  %v3411_v3 = vpop.eup %3410  ;;  %1337 = vmatmul.mubr.f32.gmra.mrb[20].mxu1 %v1336_v45  ;;  %2371 = vmatmul.mubr.f32.gmra.mrb[24].mxu0 %v4464_v20  ;;  %v4486_v56 = vand.u32 4294901760, %v3409_v34  ;;  %v4904_v14 = vand.u32 4294901760, %v4476_v13  ;;  %v1351_v52 = vand.u32 4294901760, %v1350_v0  ;;  %v4969_v0 = vld [vmem:[#allocation30_spill] sm:$0xff] }
 0x191   : > { %3064 = vmatpush3.bf16.msra.mxu1 %v4966_v37  ;;  %v1345_v49 = vand.u32 4294901760, %v1344_v55  ;;  %v4490_v16 = vand.u32 4294901760, %v3411_v3  ;;  %v4907_v9 = vand.u32 4294901760, %v4483_v43 }
 0x192   : > { %4965 = vst [vmem:[#allocation39_spill] sm:$0xff] %v4486_v56  ;;  %3066 = vmatprep.subr.bf16.mxu1 %v4968_v10  ;;  %v1365_v45 = vsub.f32 %v4476_v13, %v4904_v14  ;;  %v4498_v25 = vsub.f32 %v3409_v34, %v4486_v56 }
 0x193   : > { %4967 = vst [vmem:[#allocation28_spill] sm:$0xff] %v4490_v16  ;;  %1346 = vmatprep.mubr.f32.mxu1 %v1345_v49  ;;  %2376 = vmatprep.mubr.f32.mxu0 %v4490_v16  ;;  %v1359_v37 = vsub.f32 %v4483_v43, %v4907_v9  ;;  %v4505_v55 = vsub.f32 %v3411_v3, %v4490_v16  ;;  %v4970_v49 = vld [vmem:[#allocation31_spill] sm:$0xff] }
 0x194   : > { %1352 = vmatmul.mubr.f32.gmra.mrb[22].mxu1 %v1351_v52  ;;  %2378 = vmatmul.mubr.f32.gmra.mrb[26].mxu0 %v4486_v56  ;;  %v4908_v10 = vand.u32 4294901760, %v4498_v25  ;;  %v1366_v13 = vand.u32 4294901760, %v1365_v45  ;;  %v4979_v45 = vpack.c.bf16 %v4085_v32, %v4083_v40 }
 0x195   : > { %3068 = vmatpush3.bf16.msra.mxu1 %v4969_v0  ;;  %v1360_v14 = vand.u32 4294901760, %v1359_v37  ;;  %v4909_v34 = vand.u32 4294901760, %v4505_v55  ;;  %v4980_v0 = vpack.c.bf16 %v4089_v29, %v4087_v35 }
 0x196   : > { %3070 = vmatprep.subr.bf16.mxu1 %v4970_v49  ;;  %v1380_v9 = vsub.f32 %v4498_v25, %v4908_v10  ;;  %v4981_v49 = vpack.c.bf16 %v4093_v18, %v4091_v1  ;;  %v5002_v10 = vld [vmem:[#allocation9_spill] sm:$0xff] }
 0x197   : > { %1361 = vmatprep.mubr.f32.mxu1 %v1360_v14  ;;  %v1374_v52 = vsub.f32 %v4505_v55, %v4909_v34  ;;  %v4971_v14 = vpack.c.bf16 %v3821_v58, %v3819_v57  ;;  %v5003_v34 = vld [vmem:[#allocation22_spill] sm:$0xff] }
 0x198   : > { %1367 = vmatmul.mubr.f32.gmra.mrb[24].mxu1 %v1366_v13  ;;  %v1381_v37 = vand.u32 4294901760, %v1380_v9  ;;  %v4973_v9 = vpack.c.bf16 %v3851_v26, %v3840_v12  ;;  %v4978_v13 = vpack.c.bf16 %v3971_v11, %v3969_v8 }
 0x199   : > { %3072 = vmatpush3.bf16.msra.mxu1 %v4277_v21  ;;  %v1375_v3 = vand.u32 4294901760, %v1374_v52  ;;  %v4972_v21 = vpack.c.bf16 %v3838_v2, %v3823_v61  ;;  %v4982_v52 = vpack.c.bf16 %v4097_v4, %v4095_v7 }
 0x19a   : > { %3074 = vmatprep.subr.bf16.mxu1 %v4285_v36  ;;  %v4974_v36 = vpack.c.bf16 %v3859_v42, %v3857_v41 }
 0x19b   : > { %1376 = vmatprep.mubr.f32.mxu1 %v1375_v3  ;;  %v4983_v3 = vpack.c.bf16 %v4101_v38, %v4099_v33 }
 0x19c   : > { %1382 = vmatmul.mubr.f32.gmra.mrb[26].mxu1 %v1381_v37  ;;  %v4984_v37 = vpack.c.bf16 %v4105_v60, %v4103_v59 }
 0x19d   : > { %3076 = vmatpush3.bf16.msra.mxu1 %v4289_v46  ;;  %1612 = vmatprep.mubr.f32.mxu1 %v4362_v30  ;;  %v4976_v46 = vpack.c.bf16 %v3875_v51, %v3873_v50 }
 0x19e   : > { %3078 = vmatprep.subr.bf16.mxu1 %v4294_v54  ;;  %v4975_v54 = vpack.c.bf16 %v3868_v48, %v3866_v47 }
 0x1a1   : > { %3080 = vmatpush3.bf16.msra.mxu1 %v4299_v17  ;;  %v4977_v17 = vpack.c.bf16 %v3965_v6, %v3963_v5 }
 0x1a2   : > { %3082 = vmatprep.subr.bf16.mxu1 %v4971_v14  ;;  %v4985_v14 = vld [vmem:[#allocation19_spill] sm:$0xff] }
 0x1a4   : > { %1614 = vmatmul.mubr.f32.vlgmr.msra.gmra.mrb[28].mxu1 %v4358_v62 }
 0x1a5   : > { %1619 = vmatprep.mubr.f32.mxu1 %v4379_v27  ;;  %3084 = vmatpush3.bf16.msra.mxu1 %v4972_v21  ;;  %v4986_v21 = vpack.c.bf16 %v4109_v19, %v4985_v14 }
 0x1a6   : > { %3086 = vmatprep.subr.bf16.mxu1 %v4973_v9  ;;  %v4987_v9 = vld [vmem:[#allocation21_spill] sm:$0xff] }
 0x1a8   : > { %1621 = vmatmul.mubr.f32.gmra.mrb[30].mxu1 %v4376_v53 }
 0x1a9   : > { %1626 = vmatprep.mubr.f32.mxu1 %v4403_v39  ;;  %3088 = vmatpush3.bf16.msra.mxu1 %v4974_v36  ;;  %v4988_v36 = vld [vmem:[#allocation20_spill] sm:$0xff] }
 0x1aa   : > { %3090 = vmatprep.subr.bf16.mxu1 %v4975_v54  ;;  %v4989_v54 = vpack.c.bf16 %v4987_v9, %v4988_v36 }
 0x1ac   : > { %1628 = vmatmul.mubr.f32.gmra.mrb[32].mxu1 %v4400_v23 }
 0x1ad   : > { %1633 = vmatprep.mubr.f32.mxu1 %v4424_v24  ;;  %3092 = vmatpush3.bf16.msra.mxu1 %v4976_v46  ;;  %v4990_v46 = vld [vmem:[#allocation3_spill] sm:$0xff] }
 0x1ae   : > { %3094 = vmatprep.subr.bf16.mxu1 %v4977_v17  ;;  %v4991_v17 = vld [vmem:[#allocation32_spill] sm:$0xff] }
 0x1b0   : > { %1635 = vmatmul.mubr.f32.gmra.mrb[34].mxu1 %v4420_v44 }
 0x1b1   : > { %1640 = vmatprep.mubr.f32.mxu1 %v4446_v28  ;;  %3096 = vmatpush3.bf16.msra.mxu1 %v4978_v13  ;;  %v4992_v13 = vld [vmem:[#allocation34_spill] sm:$0xff] }
 0x1b2   : > { %3098 = vmatprep.subr.bf16.mxu1 %v4979_v45  ;;  %v4993_v45 = vld [vmem:[#allocation4_spill] sm:$0xff] }
 0x1b4   : > { %1642 = vmatmul.mubr.f32.gmra.mrb[36].mxu1 %v4442_v63  ;;  %v5017_v63 = vld [vmem:[#allocation18_spill] sm:$0xff] }
 0x1b5   : > { %1647 = vmatprep.mubr.f32.mxu1 %v4468_v31  ;;  %3100 = vmatpush3.bf16.msra.mxu1 %v4980_v0  ;;  %v4994_v0 = vld [vmem:[#allocation5_spill] sm:$0xff] }
 0x1b6   : > { %3102 = vmatprep.subr.bf16.mxu1 %v4981_v49  ;;  %v4995_v49 = vld [vmem:[#allocation33_spill] sm:$0xff] }
 0x1b8   : > { %1649 = vmatmul.mubr.f32.gmra.mrb[38].mxu1 %v4464_v20  ;;  %v5014_v20 = vld [vmem:[#allocation17_spill] sm:$0xff] }
 0x1b9   : > { %1654 = vmatprep.mubr.f32.mxu1 %v4490_v16  ;;  %3104 = vmatpush3.bf16.msra.mxu1 %v4982_v52  ;;  %v4996_v52 = vld [vmem:[#allocation36_spill] sm:$0xff]  ;;  %v5009_v16 = vld [vmem:[#allocation27_spill] sm:$0xff] }
 0x1ba   : > { %3106 = vmatprep.subr.bf16.mxu1 %v4983_v3  ;;  %v4997_v3 = vld [vmem:[#allocation6_spill] sm:$0xff] }
 0x1bc   : > { %1656 = vmatmul.mubr.f32.gmra.mrb[40].mxu1 %v4486_v56  ;;  %v5006_v56 = vld [vmem:[#allocation25_spill] sm:$0xff] }
 0x1bd   : > { %3108 = vmatpush3.bf16.msra.mxu1 %v4984_v37  ;;  %1791 = vmatprep.mubr.f32.mxu1 %v4371_v15  ;;  %v4998_v37 = vld [vmem:[#allocation7_spill] sm:$0xff] }
 0x1be   : > { %3110 = vmatprep.subr.bf16.mxu1 %v4986_v21  ;;  %v4999_v21 = vld [vmem:[#allocation35_spill] sm:$0xff] }
 0x1c1   : > { %3112 = vmatpush3.bf16.msra.mxu1 %v4989_v54  ;;  %v5000_v54 = vld [vmem:[#allocation23_spill] sm:$0xff] }
 0x1c2   : > { %3114 = vmatprep.subr.bf16.mxu1 %v4990_v46  ;;  %v5001_v46 = vld [vmem:[#allocation8_spill] sm:$0xff] }
 0x1c4   : > { %1794 = vmatmul.mubr.f32.vlgmr.msra.gmra.mrb[42].mxu1 %v4991_v17 }
 0x1c5   : > { %1800 = vmatprep.mubr.f32.mxu1 %v4992_v13  ;;  %3116 = vmatpush3.bf16.msra.mxu1 %v4993_v45  ;;  %v5004_v45 = vld [vmem:[#allocation10_spill] sm:$0xff] }
 0x1c6   : > { %3118 = vmatprep.subr.bf16.mxu1 %v4994_v0  ;;  %v5005_v0 = vld [vmem:[#allocation11_spill] sm:$0xff] }
 0x1c8   : > { %1803 = vmatmul.mubr.f32.gmra.mrb[44].mxu1 %v4995_v49 }
 0x1c9   : > { %1809 = vmatprep.mubr.f32.mxu1 %v4996_v52  ;;  %3120 = vmatpush3.bf16.msra.mxu1 %v4997_v3  ;;  %v5007_v3 = vld [vmem:[#allocation12_spill] sm:$0xff] }
 0x1ca   : > { %3122 = vmatprep.subr.bf16.mxu1 %v4998_v37  ;;  %v5008_v37 = vld [vmem:[#allocation13_spill] sm:$0xff] }
 0x1cc   : > { %1812 = vmatmul.mubr.f32.gmra.mrb[46].mxu1 %v4999_v21 }
 0x1cd   : > { %1818 = vmatprep.mubr.f32.mxu1 %v5000_v54  ;;  %3124 = vmatpush3.bf16.msra.mxu1 %v5001_v46  ;;  %v5011_v46 = vld [vmem:[#allocation15_spill] sm:$0xff] }
 0x1ce   : > { %3126 = vmatprep.subr.bf16.mxu1 %v5002_v10  ;;  %v5010_v10 = vld [vmem:[#allocation14_spill] sm:$0xff] }
 0x1d0   : > { %1821 = vmatmul.mubr.f32.gmra.mrb[48].mxu1 %v5003_v34 }
 0x1d1   : > { %1827 = vmatprep.mubr.f32.mxu1 %v4461_v22  ;;  %3128 = vmatpush3.bf16.msra.mxu1 %v5004_v45  ;;  %v5012_v45 = vld [vmem:[#allocation16_spill] sm:$0xff] }
 0x1d2   : > { %3130 = vmatprep.subr.bf16.mxu1 %v5005_v0  ;;  %v5013_v0 = vand.u32 4294901760, %v4371_v15  ;;  %v5021_v15 = vand.u32 4294901760, %v3851_v26  ;;  %v5028_v26 = vand.u32 4294901760, %v4995_v49  ;;  %v5035_v49 = vand.u32 4294901760, %v5000_v54 }
 0x1d3   : > { %v5042_v54 = vand.u32 4294901760, %v4087_v35  ;;  %v5049_v35 = vand.u32 4294901760, %v4097_v4  ;;  %v5056_v4 = vand.u32 4294901760, %v4985_v14 }
 0x1d4   : > { %1830 = vmatmul.mubr.f32.gmra.mrb[50].mxu1 %v5006_v56 }
 0x1d5   : > { %1836 = vmatprep.mubr.f32.mxu1 %v4483_v43  ;;  %3132 = vmatpush3.bf16.msra.mxu1 %v5007_v3  ;;  %v5015_v3 = vand.u32 4294901760, %v3819_v57  ;;  %v5023_v57 = vand.u32 4294901760, %v4992_v13 }
 0x1d6   : > { %3134 = vmatprep.subr.bf16.mxu1 %v5008_v37  ;;  %v5016_v37 = vand.u32 4294901760, %v3821_v58  ;;  %v5024_v58 = vand.u32 4294901760, %v3857_v41  ;;  %v5031_v41 = vand.u32 4294901760, %v3875_v51  ;;  %v5038_v51 = vand.u32 4294901760, %v4083_v40 }
 0x1d7   : > { %v5045_v40 = vand.u32 4294901760, %v4093_v18  ;;  %v5052_v18 = vand.u32 4294901760, %v5009_v16 }
 0x1d8   : > { %1839 = vmatmul.mubr.f32.gmra.mrb[52].mxu1 %v5009_v16  ;;  %v3145_v31 = vpack.c.bf16 %v5016_v37, %v5015_v3  ;;  %v5059_v16 = vand.u32 4294901760, %v4988_v36 }
 0x1d9   : > { %1845 = vmatprep.mubr.f32.mxu1 %v4505_v55  ;;  %3136 = vmatpush3.bf16.msra.mxu1 %v5010_v10  ;;  %v5018_v10 = vand.u32 4294901760, %v3823_v61  ;;  %v5025_v61 = vand.u32 4294901760, %v3859_v42  ;;  %v5032_v42 = vand.u32 4294901760, %v3963_v5  ;;  %v5039_v5 = vand.u32 4294901760, %v4085_v32 }
 0x1da   : > { %3138 = vmatprep.subr.bf16.mxu1 %v5011_v46  ;;  %v5019_v46 = vand.u32 4294901760, %v3838_v2  ;;  %v5026_v2 = vand.u32 4294901760, %v3866_v47  ;;  %v5033_v47 = vand.u32 4294901760, %v3965_v6  ;;  %v5040_v6 = vand.u32 4294901760, %v5003_v34 }
 0x1db   : > { %v5046_v32 = vand.u32 4294901760, %v5006_v56  ;;  %v5047_v34 = vand.u32 4294901760, %v4483_v43  ;;  %v5053_v56 = vand.u32 4294901760, %v4505_v55  ;;  %v5054_v43 = vand.u32 4294901760, %v4103_v59 }
 0x1dc   : > { %1848 = vmatmul.mubr.f32.gmra.mrb[54].mxu1 %v4498_v25  ;;  %v3147_v28 = vpack.c.bf16 %v5019_v46, %v5018_v10  ;;  %v3157_v3 = vpack.c.bf16 %v5033_v47, %v5032_v42  ;;  %v3161_v10 = vpack.c.bf16 %v5039_v5, %v5038_v51  ;;  %v5060_v55 = vand.u32 4294901760, %v4987_v9 }
 0x1dd   : > { %3140 = vmatpush3.bf16.msra.mxu1 %v5012_v45  ;;  %1952 = vmatprep.mubr.f32.mxu1 %v5013_v0  ;;  %v5020_v45 = vand.u32 4294901760, %v3840_v12  ;;  %v5027_v12 = vand.u32 4294901760, %v3868_v48  ;;  %v5034_v48 = vand.u32 4294901760, %v4999_v21  ;;  %v5041_v21 = vand.u32 4294901760, %v4461_v22 }
 0x1de   : > { %3142 = vmatprep.subr.bf16.mxu1 %v5014_v20  ;;  %v5022_v20 = vand.u32 4294901760, %v4991_v17  ;;  %v5029_v17 = vand.u32 4294901760, %v4996_v52  ;;  %v5036_v52 = vand.u32 4294901760, %v3969_v8  ;;  %v5043_v8 = vand.u32 4294901760, %v4089_v29 }
 0x1df   : > { %v3149_v0 = vpack.c.bf16 %v5021_v15, %v5020_v45  ;;  %v5048_v22 = vand.u32 4294901760, %v4095_v7  ;;  %v5050_v29 = vand.u32 4294901760, %v4099_v33  ;;  %v5055_v7 = vand.u32 4294901760, %v4105_v60  ;;  %v5061_v60 = vld [vmem:[#allocation24_spill] sm:$0xff] }
 0x1e0   : > { %v3163_v46 = vpack.c.bf16 %v5043_v8, %v5042_v54  ;;  %v5057_v33 = vand.u32 4294901760, %v4109_v19  ;;  %v3175_v59 = vpack.c.bf16 %v5060_v55, %v5059_v16  ;;  %v5062_v19 = vld [vmem:[#allocation37_spill] sm:$0xff] }
 0x1e1   : > { %3144 = vmatpush3.bf16.msra.mxu1 %v5017_v63  ;;  %v3151_v63 = vpack.c.bf16 %v5025_v61, %v5024_v58  ;;  %v3167_v15 = vpack.c.bf16 %v5049_v35, %v5048_v22 }
 0x1e2   : > { %3146 = vmatprep.subr.bf16.mxu1 %v3145_v31  ;;  %v3153_v31 = vpack.c.bf16 %v5027_v12, %v5026_v2 }
 0x1e4   : > { %1956 = vmatmul.mubr.f32.vlgmr.msra.gmra.mrb[56].mxu1 %v5022_v20  ;;  %v3171_v20 = vpack.c.bf16 %v5055_v7, %v5054_v43 }
 0x1e5   : > { %1963 = vmatprep.mubr.f32.mxu1 %v5023_v57  ;;  %3148 = vmatpush3.bf16.msra.mxu1 %v3147_v28  ;;  %v5030_v28 = vand.u32 4294901760, %v3873_v50  ;;  %v5037_v50 = vand.u32 4294901760, %v3971_v11  ;;  %v5044_v11 = vand.u32 4294901760, %v4091_v1  ;;  %v5051_v1 = vand.u32 4294901760, %v4101_v38 }
 0x1e6   : > { %3150 = vmatprep.subr.bf16.mxu1 %v3149_v0  ;;  %v3173_v57 = vpack.c.bf16 %v5057_v33, %v5056_v4  ;;  %v5058_v38 = vand.u32 4294901760, %v4498_v25  ;;  %v5064_v25 = vld [vmem:[#allocation38_spill] sm:$0xff] }
 0x1e7   : > { %v3155_v13 = vpack.c.bf16 %v5031_v41, %v5030_v28  ;;  %v3159_v37 = vpack.c.bf16 %v5037_v50, %v5036_v52  ;;  %v3165_v45 = vpack.c.bf16 %v5045_v40, %v5044_v11  ;;  %v3169_v0 = vpack.c.bf16 %v5051_v1, %v5050_v29 }
 0x1e8   : > { %1967 = vmatmul.mubr.f32.gmra.mrb[58].mxu1 %v5028_v26 }
 0x1e9   : > { %1974 = vmatprep.mubr.f32.mxu1 %v5029_v17  ;;  %3152 = vmatpush3.bf16.msra.mxu1 %v3151_v63 }
 0x1ea   : > { %3154 = vmatprep.subr.bf16.mxu1 %v3153_v31 }
 0x1ec   : > { %1978 = vmatmul.mubr.f32.gmra.mrb[60].mxu1 %v5034_v48 }
 0x1ed   : > { %1985 = vmatprep.mubr.f32.mxu1 %v5035_v49  ;;  %3156 = vmatpush3.bf16.msra.mxu1 %v3155_v13 }
 0x1ee   : > { %3158 = vmatprep.subr.bf16.mxu1 %v3157_v3 }
 0x1f0   : > { %1989 = vmatmul.mubr.f32.gmra.mrb[62].mxu1 %v5040_v6 }
 0x1f1   : > { %1996 = vmatprep.mubr.f32.mxu1 %v5041_v21  ;;  %3160 = vmatpush3.bf16.msra.mxu1 %v3159_v37 }
 0x1f2   : > { %3162 = vmatprep.subr.bf16.mxu1 %v3161_v10 }
 0x1f4   : > { %2000 = vmatmul.mubr.f32.gmra.mrb[64].mxu1 %v5046_v32 }
 0x1f5   : > { %2007 = vmatprep.mubr.f32.mxu1 %v5047_v34  ;;  %3164 = vmatpush3.bf16.msra.mxu1 %v3163_v46 }
 0x1f6   : > { %3166 = vmatprep.subr.bf16.mxu1 %v3165_v45 }
 0x1f8   : > { %2011 = vmatmul.mubr.f32.gmra.mrb[66].mxu1 %v5052_v18 }
 0x1f9   : > { %2018 = vmatprep.mubr.f32.mxu1 %v5053_v56  ;;  %3168 = vmatpush3.bf16.msra.mxu1 %v3167_v15  ;;  %v2637_v15 = vld [vmem:[%s4822_s4] ss:$0 sm:$0xff] }
 0x1fa   : > { %3170 = vmatprep.subr.bf16.mxu1 %v3169_v0 }
 0x1fc   : > { %2022 = vmatmul.mubr.f32.gmra.mrb[68].mxu1 %v5058_v38 }
 0x1fd   : > { %3172 = vmatpush3.bf16.msra.mxu1 %v3171_v20  ;;  %2188 = vmatprep.mubr.f32.mxu1 %v4362_v30  ;;  %v5063_v30 = vld [vmem:[#allocation26_spill] sm:$0xff] }
 0x1fe   : > { %3174 = vmatprep.subr.bf16.mxu1 %v3173_v57 }
 0x201   : > { %3176 = vmatpush3.bf16.msra.mxu1 %v3175_v59 }
 0x204   : > { %2190 = vmatmul.mubr.f32.vlgmr.msra.gmra.mrb[70].mxu1 %v4358_v62  ;;  %v5065_v62 = vld [vmem:[#allocation28_spill] sm:$0xff] }
 0x205   : > { %2195 = vmatprep.mubr.f32.mxu1 %v4379_v27  ;;  %v5066_v27 = vld [vmem:[#allocation39_spill] sm:$0xff] }
 0x208   : > { %2197 = vmatmul.mubr.f32.gmra.mrb[72].mxu1 %v4376_v53 }
 0x209   : > { %2202 = vmatprep.mubr.f32.mxu1 %v4403_v39 }
 0x20c   : > { %2204 = vmatmul.mubr.f32.gmra.mrb[74].mxu1 %v4400_v23 }
 0x20d   : > { %2209 = vmatprep.mubr.f32.mxu1 %v4424_v24 }
 0x210   : > { %2211 = vmatmul.mubr.f32.gmra.mrb[76].mxu1 %v4420_v44 }
 0x211   : > { %2216 = vmatprep.mubr.f32.mxu1 %v5061_v60 }
 0x214   : > { %2218 = vmatmul.mubr.f32.gmra.mrb[78].mxu1 %v5062_v19 }
 0x215   : > { %2223 = vmatprep.mubr.f32.mxu1 %v5063_v30 }
 0x218   : > { %2225 = vmatmul.mubr.f32.gmra.mrb[80].mxu1 %v5064_v25 }
 0x219   : > { %2230 = vmatprep.mubr.f32.mxu1 %v5065_v62 }
 0x21c   : > { %2232 = vmatmul.mubr.f32.gmra.mrb[82].mxu1 %v5066_v27 }
 0x24f   : > { %v2948_v53 = vpop.f32.mrb[14].mxu0 }
 0x250   : > { %v2949_v39 = vpop.f32.mrb[15].mxu0 }
 0x251   : > { %v4721_v14 = vadd.f32 %v2949_v39, %v2948_v53 }
 0x253   : > { %v2951_v23 = vpop.f32.mrb[16].mxu0 }
 0x254   : > { %v2952_v24 = vpop.f32.mrb[17].mxu0 }
 0x255   : > { %v4723_v9 = vadd.f32 %v2952_v24, %v2951_v23 }
 0x257   : > { %v2683_v44 = vpop.f32.mrb[14].mxu1  ;;  %v2954_v36 = vpop.f32.mrb[18].mxu0 }
 0x258   : > { %v2684_v58 = vpop.f32.mrb[15].mxu1  ;;  %v2955_v61 = vpop.f32.mrb[19].mxu0 }
 0x259   : > { %v2685_v63 = vadd.f32 %v2684_v58, %v2683_v44  ;;  %v4725_v2 = vadd.f32 %v2955_v61, %v2954_v36 }
 0x25b   : > { %v2686_v12 = vpop.f32.mrb[16].mxu1  ;;  %v2957_v31 = vpop.f32.mrb[20].mxu0  ;;  %v1294_v0 = vadd.f32 %v2685_v63, %v2637_v15 }
 0x25c   : > { %v2687_v26 = vpop.f32.mrb[17].mxu1  ;;  %v2958_v17 = vpop.f32.mrb[21].mxu0 }
 0x25d   : > { %v2688_v28 = vadd.f32 %v2687_v26, %v2686_v12  ;;  %v4727_v41 = vadd.f32 %v2958_v17, %v2957_v31 }
 0x25f   : > { %v2689_v13 = vpop.f32.mrb[18].mxu1  ;;  %v2960_v42 = vpop.f32.mrb[22].mxu0  ;;  %v1309_v20 = vadd.f32 %v2688_v28, %v2637_v15 }
 0x260   : > { %v2690_v47 = vpop.f32.mrb[19].mxu1  ;;  %v2961_v3 = vpop.f32.mrb[23].mxu0 }
 0x261   : > { %v2691_v48 = vadd.f32 %v2690_v47, %v2689_v13  ;;  %v4729_v49 = vadd.f32 %v2961_v3, %v2960_v42 }
 0x263   : > { %v2692_v52 = vpop.f32.mrb[20].mxu1  ;;  %v2963_v50 = vpop.f32.mrb[24].mxu0  ;;  %v1324_v16 = vadd.f32 %v2691_v48, %v2637_v15 }
 0x264   : > { %v2693_v37 = vpop.f32.mrb[21].mxu1  ;;  %v2964_v51 = vpop.f32.mrb[25].mxu0 }
 0x265   : > { %v2694_v5 = vadd.f32 %v2693_v37, %v2692_v52  ;;  %v4731_v10 = vadd.f32 %v2964_v51, %v2963_v50 }
 0x267   : > { %v2695_v6 = vpop.f32.mrb[22].mxu1  ;;  %v2966_v21 = vpop.f32.mrb[26].mxu0  ;;  %v1339_v30 = vadd.f32 %v2694_v5, %v2637_v15 }
 0x268   : > { %v2696_v54 = vpop.f32.mrb[23].mxu1  ;;  %v2967_v8 = vpop.f32.mrb[27].mxu0 }
 0x269   : > { %v2697_v46 = vadd.f32 %v2696_v54, %v2695_v6  ;;  %v4733_v11 = vadd.f32 %v2967_v8, %v2966_v21 }
 0x26b   : > { %v2698_v40 = vpop.f32.mrb[24].mxu1  ;;  %v1354_v39 = vadd.f32 %v2697_v46, %v2637_v15 }
 0x26c   : > { %v2699_v45 = vpop.f32.mrb[25].mxu1 }
 0x26d   : > { %v2700_v32 = vadd.f32 %v2699_v45, %v2698_v40 }
 0x26f   : > { %v2701_v34 = vpop.f32.mrb[26].mxu1  ;;  %v1369_v58 = vadd.f32 %v2700_v32, %v2637_v15 }
 0x270   : > { %v2702_v22 = vpop.f32.mrb[27].mxu1 }
 0x271   : > { %v2703_v35 = vadd.f32 %v2702_v22, %v2701_v34 }
 0x273   : > { %v1384_v26 = vadd.f32 %v2703_v35, %v2637_v15 }
 0x277   : > { %v2736_v29 = vpop.f32.mrb[28].mxu1 }
 0x278   : > { %v2737_v1 = vpop.f32.mrb[29].mxu1 }
 0x279   : > { %v2738_v18 = vadd.f32 %v2737_v1, %v2736_v29 }
 0x27b   : > { %v1616_v56 = vadd.f32 %v2738_v18, %v1294_v0  ;;  %v2739_v43 = vpop.f32.mrb[30].mxu1 }
 0x27c   : > { %v2740_v7 = vpop.f32.mrb[31].mxu1 }
 0x27d   : > { %v2741_v4 = vadd.f32 %v2740_v7, %v2739_v43 }
 0x27f   : > { %v1623_v33 = vadd.f32 %v2741_v4, %v1309_v20  ;;  %v2742_v57 = vpop.f32.mrb[32].mxu1 }
 0x280   : > { %v2743_v38 = vpop.f32.mrb[33].mxu1 }
 0x281   : > { %v2744_v55 = vadd.f32 %v2743_v38, %v2742_v57 }
 0x283   : > { %v1630_v59 = vadd.f32 %v2744_v55, %v1324_v16  ;;  %v2745_v60 = vpop.f32.mrb[34].mxu1 }
 0x284   : > { %v2746_v19 = vpop.f32.mrb[35].mxu1 }
 0x285   : > { %v2747_v25 = vadd.f32 %v2746_v19, %v2745_v60 }
 0x287   : > { %v1637_v62 = vadd.f32 %v2747_v25, %v1339_v30  ;;  %v2748_v27 = vpop.f32.mrb[36].mxu1 }
 0x288   : > { %v2749_v53 = vpop.f32.mrb[37].mxu1 }
 0x289   : > { %v2750_v23 = vadd.f32 %v2749_v53, %v2748_v27 }
 0x28b   : > { %v1644_v24 = vadd.f32 %v2750_v23, %v1354_v39  ;;  %v2751_v44 = vpop.f32.mrb[38].mxu1 }
 0x28c   : > { %v2752_v36 = vpop.f32.mrb[39].mxu1 }
 0x28d   : > { %v2753_v61 = vadd.f32 %v2752_v36, %v2751_v44 }
 0x28f   : > { %v1651_v63 = vadd.f32 %v2753_v61, %v1369_v58  ;;  %v2754_v12 = vpop.f32.mrb[40].mxu1 }
 0x290   : > { %v2755_v31 = vpop.f32.mrb[41].mxu1 }
 0x291   : > { %v2756_v17 = vadd.f32 %v2755_v31, %v2754_v12 }
 0x293   : > { %v1658_v28 = vadd.f32 %v2756_v17, %v1384_v26 }
 0x297   : > { %v2789_v13 = vpop.f32.mrb[42].mxu1 }
 0x298   : > { %v2790_v42 = vpop.f32.mrb[43].mxu1 }
 0x299   : > { %v2791_v47 = vadd.f32 %v2790_v42, %v2789_v13 }
 0x29b   : > { %v1796_v3 = vadd.f32 %v2791_v47, %v1616_v56  ;;  %v2792_v48 = vpop.f32.mrb[44].mxu1 }
 0x29c   : > { %v2793_v52 = vpop.f32.mrb[45].mxu1 }
 0x29d   : > { %v2794_v50 = vadd.f32 %v2793_v52, %v2792_v48 }
 0x29f   : > { %v1805_v37 = vadd.f32 %v2794_v50, %v1623_v33  ;;  %v2795_v51 = vpop.f32.mrb[46].mxu1 }
 0x2a0   : > { %v2796_v5 = vpop.f32.mrb[47].mxu1 }
 0x2a1   : > { %v2797_v6 = vadd.f32 %v2796_v5, %v2795_v51 }
 0x2a3   : > { %v1814_v21 = vadd.f32 %v2797_v6, %v1630_v59  ;;  %v2798_v54 = vpop.f32.mrb[48].mxu1 }
 0x2a4   : > { %v2799_v8 = vpop.f32.mrb[49].mxu1 }
 0x2a5   : > { %v2800_v46 = vadd.f32 %v2799_v8, %v2798_v54 }
 0x2a7   : > { %v1823_v40 = vadd.f32 %v2800_v46, %v1637_v62  ;;  %v2801_v45 = vpop.f32.mrb[50].mxu1 }
 0x2a8   : > { %v2802_v32 = vpop.f32.mrb[51].mxu1 }
 0x2a9   : > { %v2803_v34 = vadd.f32 %v2802_v32, %v2801_v45 }
 0x2ab   : > { %v1832_v22 = vadd.f32 %v2803_v34, %v1644_v24  ;;  %v2804_v35 = vpop.f32.mrb[52].mxu1 }
 0x2ac   : > { %v2805_v15 = vpop.f32.mrb[53].mxu1 }
 0x2ad   : > { %v2806_v29 = vadd.f32 %v2805_v15, %v2804_v35 }
 0x2af   : > { %v1841_v1 = vadd.f32 %v2806_v29, %v1651_v63  ;;  %v2807_v0 = vpop.f32.mrb[54].mxu1 }
 0x2b0   : > { %v2808_v18 = vpop.f32.mrb[55].mxu1 }
 0x2b1   : > { %v2809_v56 = vadd.f32 %v2808_v18, %v2807_v0 }
 0x2b3   : > { %v1850_v43 = vadd.f32 %v2809_v56, %v1658_v28 }
 0x2b7   : > { %v2842_v7 = vpop.f32.mrb[56].mxu1 }
 0x2b8   : > { %v2843_v20 = vpop.f32.mrb[57].mxu1 }
 0x2b9   : > { %v2844_v4 = vadd.f32 %v2843_v20, %v2842_v7 }
 0x2bb   : > { %v1958_v33 = vadd.f32 %v2844_v4, %v1796_v3  ;;  %v2845_v57 = vpop.f32.mrb[58].mxu1 }
 0x2bc   : > { %v2846_v38 = vpop.f32.mrb[59].mxu1 }
 0x2bd   : > { %v2847_v16 = vadd.f32 %v2846_v38, %v2845_v57 }
 0x2bf   : > { %v1969_v55 = vadd.f32 %v2847_v16, %v1805_v37  ;;  %v2848_v59 = vpop.f32.mrb[60].mxu1 }
 0x2c0   : > { %v2849_v60 = vpop.f32.mrb[61].mxu1 }
 0x2c1   : > { %v2850_v19 = vadd.f32 %v2849_v60, %v2848_v59 }
 0x2c3   : > { %v1980_v30 = vadd.f32 %v2850_v19, %v1814_v21  ;;  %v2851_v25 = vpop.f32.mrb[62].mxu1 }
 0x2c4   : > { %v2852_v62 = vpop.f32.mrb[63].mxu1 }
 0x2c5   : > { %v2853_v27 = vadd.f32 %v2852_v62, %v2851_v25 }
 0x2c7   : > { %v1991_v53 = vadd.f32 %v2853_v27, %v1823_v40  ;;  %v2854_v39 = vpop.f32.mrb[64].mxu1 }
 0x2c8   : > { %v2855_v23 = vpop.f32.mrb[65].mxu1 }
 0x2c9   : > { %v2856_v24 = vadd.f32 %v2855_v23, %v2854_v39 }
 0x2cb   : > { %v2002_v44 = vadd.f32 %v2856_v24, %v1832_v22  ;;  %v2857_v36 = vpop.f32.mrb[66].mxu1 }
 0x2cc   : > { %v2858_v58 = vpop.f32.mrb[67].mxu1 }
 0x2cd   : > { %v2859_v61 = vadd.f32 %v2858_v58, %v2857_v36 }
 0x2cf   : > { %v2013_v63 = vadd.f32 %v2859_v61, %v1841_v1  ;;  %v2860_v12 = vpop.f32.mrb[68].mxu1 }
 0x2d0   : > { %v2861_v31 = vpop.f32.mrb[69].mxu1 }
 0x2d1   : > { %v2862_v26 = vadd.f32 %v2861_v31, %v2860_v12 }
 0x2d3   : > { %v2024_v17 = vadd.f32 %v2862_v26, %v1850_v43 }
 0x2d7   : > { %v2895_v28 = vpop.f32.mrb[70].mxu1 }
 0x2d8   : > { %v2896_v13 = vpop.f32.mrb[71].mxu1 }
 0x2d9   : > { %v2897_v42 = vadd.f32 %v2896_v13, %v2895_v28 }
 0x2db   : > { %v2192_v47 = vadd.f32 %v2897_v42, %v1958_v33  ;;  %v2898_v3 = vpop.f32.mrb[72].mxu1 }
 0x2dc   : > { %v2899_v48 = vpop.f32.mrb[73].mxu1 }
 0x2dd   : > { %v2338_v52 = vadd.f32 %v4721_v14, %v2192_v47  ;;  %v2900_v50 = vadd.f32 %v2899_v48, %v2898_v3 }
 0x2df   : > { %2384 = vst.msk [vmem:[%s4740_s28] sm:$0xff] %vm2383_vm1, %v2338_v52  ;;  %v2199_v37 = vadd.f32 %v2900_v50, %v1969_v55  ;;  %v2901_v51 = vpop.f32.mrb[74].mxu1 }
 0x2e0   : > { %v2902_v5 = vpop.f32.mrb[75].mxu1 }
 0x2e1   : > { %v2345_v6 = vadd.f32 %v4723_v9, %v2199_v37  ;;  %v2903_v21 = vadd.f32 %v2902_v5, %v2901_v51 }
 0x2e3   : > { %2385 = vst.msk [vmem:[%s4740_s28 + $0x8] sm:$0xff] %vm2383_vm1, %v2345_v6  ;;  %v2206_v54 = vadd.f32 %v2903_v21, %v1980_v30  ;;  %v2904_v8 = vpop.f32.mrb[76].mxu1 }
 0x2e4   : > { %v2905_v14 = vpop.f32.mrb[77].mxu1 }
 0x2e5   : > { %v2352_v46 = vadd.f32 %v4725_v2, %v2206_v54  ;;  %v2906_v40 = vadd.f32 %v2905_v14, %v2904_v8 }
 0x2e7   : > { %2386 = vst.msk [vmem:[%s4740_s28 + $0x10] sm:$0xff] %vm2383_vm1, %v2352_v46  ;;  %v2213_v45 = vadd.f32 %v2906_v40, %v1991_v53  ;;  %v2907_v32 = vpop.f32.mrb[78].mxu1 }
 0x2e8   : > { %v2908_v34 = vpop.f32.mrb[79].mxu1 }
 0x2e9   : > { %v2359_v22 = vadd.f32 %v4727_v41, %v2213_v45  ;;  %v2909_v35 = vadd.f32 %v2908_v34, %v2907_v32 }
 0x2eb   : > { %2387 = vst.msk [vmem:[%s4740_s28 + $0x18] sm:$0xff] %vm2383_vm1, %v2359_v22  ;;  %v2220_v9 = vadd.f32 %v2909_v35, %v2002_v44  ;;  %v2910_v15 = vpop.f32.mrb[80].mxu1 }
 0x2ec   : > { %v2911_v29 = vpop.f32.mrb[81].mxu1 }
 0x2ed   : > { %v2366_v1 = vadd.f32 %v4729_v49, %v2220_v9  ;;  %v2912_v0 = vadd.f32 %v2911_v29, %v2910_v15 }
 0x2ef   : > { %2388 = vst.msk [vmem:[%s4740_s28 + $0x20] sm:$0xff] %vm2383_vm1, %v2366_v1  ;;  %v2227_v2 = vadd.f32 %v2912_v0, %v2013_v63  ;;  %v2913_v18 = vpop.f32.mrb[82].mxu1 }
 0x2f0   : > { %v2914_v56 = vpop.f32.mrb[83].mxu1 }
 0x2f1   : > { %v2373_v43 = vadd.f32 %v4731_v10, %v2227_v2  ;;  %v2915_v7 = vadd.f32 %v2914_v56, %v2913_v18  ;;  %2397 = sbr.rel (!%p3560_p4) target bundleno = 821 (0x335), region = 44 }
 0x2f3   : > { %2389 = vst.msk [vmem:[%s4740_s28 + $0x28] sm:$0xff] %vm2383_vm1, %v2373_v43  ;;  %v2234_v41 = vadd.f32 %v2915_v7, %v2024_v17 }
 0x2f5   : > { %v2380_v20 = vadd.f32 %v4733_v11, %v2234_v41 }
 0x2f7   : > { %2390 = vst.msk [vmem:[%s4740_s28 + $0x30] sm:$0xff] %vm2383_vm1, %v2380_v20 }
 0x2f8   : > { %s5074_s18 = smov (!%p2400_p8, %s2399_s18), 7 }
 0x2f9   : > { %s2638_s9 = sshll.u32 %s5074_s18, 7 }
 0x2fa   : > { %p2641_p9 = scmp.eq.s32.totalorder %s2638_s9, 0 }
 0x2fb   : > { %3412 = sdivrem.u32 (!%p2641_p9), %s5074_s18, 7 }
 0x2fc   : > { %2408 = sbr.rel (%p2641_p9) target bundleno = 821 (0x335), region = 48 }
 0x304   : > { %s4775_s26 = spop.drf %3412 }
 0x305   : > { %p2642_p10 = scmp.le.s32.totalorder %s4775_s26, 0 }
 0x306   : > { %s5067_s21 = smov (!%p2642_p10), %s4769_s7  ;;  %s5068_s8 = smov (!%p2642_p10), %s4740_s28 }
 0x307   : > { %2588 = sbr.rel (%p2642_p10) target bundleno = 792 (0x318), region = 124  ;;  %s4784_s10 = smov (!%p2642_p10), 0  }
 0x308   : > { %s4786_s11 = smov (!%p2642_p10), 0  }
 0x30e LB: >> { %v2484_v49 = vld [vmem:[%s3478_s8] sm:$0xff]  ;;  %v2486_v10 = vld [vmem:[%s3478_s8 + $0x8] sm:$0xff]  ;;  %v2488_v11 = vld [vmem:[%s3478_s8 + $0x10] sm:$0xff]  ;;  %s2498_s12 = sadd.s32 1, %s3482_s10  ;;  %s2478_s11 = sadd.s32 1, %s3486_s11   ;;  %s3486_s11 = sphi %s4786_s11, %s2478_s11   ;;  %s3482_s10 = sphi %s4784_s10, %s5069_s10   ;;  %s3478_s8 = sphi %s5068_s8, %s2503_s8   ;;  %s3474_s21 = sphi %s5067_s21, %s2504_s21  }
 0x30f   : >> { %2485 = vst [vmem:[%s3474_s21] sm:$0xff] %v2484_v49  ;;  %2487 = vst [vmem:[%s3474_s21 + $0x8] sm:$0xff] %v2486_v10  ;;  %v2490_v4 = vld [vmem:[%s3478_s8 + $0x18] sm:$0xff]  ;;  %v2492_v33 = vld [vmem:[%s3478_s8 + $0x20] sm:$0xff]  ;;  %p2499_p11 = scmp.ge.s32.totalorder %s2498_s12, %s4775_s26  ;;  %p2477_p12 = scmp.ge.s32.totalorder %s2478_s11, %s4775_s26 }
 0x310   : >> { %2489 = vst [vmem:[%s3474_s21 + $0x10] sm:$0xff] %v2488_v11  ;;  %v2494_v57 = vld [vmem:[%s3478_s8 + $0x28] sm:$0xff]  ;;  %2491 = vst [vmem:[%s3474_s21 + $0x18] sm:$0xff] %v2490_v4  ;;  %v2496_v38 = vld [vmem:[%s3478_s8 + $0x30] sm:$0xff] }
 0x311   : >> { %2493 = vst [vmem:[%s3474_s21 + $0x20] sm:$0xff] %v2492_v33  ;;  %2495 = vst [vmem:[%s3474_s21 + $0x28] sm:$0xff] %v2494_v57  ;;  %s5076_s12 = smov (%p2499_p11, %s2498_s12), 0  ;;  %2480 = sbr.rel (!%p2477_p12) target bundleno = 782 (0x30e), region = 130 }
 0x312   : >> { %2497 = vst [vmem:[%s3474_s21 + $0x30] sm:$0xff] %v2496_v38  ;;  %s2501_s13 = smul.u32 56, %s5076_s12  ;;  %s5069_s10 = smov %s5076_s12 }
 0x314   : >> { %s2503_s8 = scalar_lea.vmem %s4740_s28, %s2501_s13 [#allocation2]   ;;  %s2504_s21 = scalar_lea.vmem %s4769_s7, %s2501_s13  }
 0x318 PF: > { %3414 = sdivrem.u32 %s5074_s18, 7 }
 0x319   : > { %s2643_s14 = smul.u32 56, %s4775_s26 }
 0x31b   : > { %s2509_s15 = scalar_lea.vmem %s4740_s28, %s2643_s14 [#allocation2]   ;;  %s2511_s16 = scalar_lea.vmem %s4769_s7, %s2643_s14  }
 0x321   : > { %s3415_s17 = spop.drf %3414 }
 0x322   : > { %p2645_p13 = scmp.le.s32.totalorder %s3415_s17, 0 }
 0x323   : > { %s3488_s20 = smov (!%p2645_p13), %s2511_s16   ;;  %s3492_s23 = smov (!%p2645_p13), %s2509_s15  }
 0x324   : > { %2602 = sbr.rel (%p2645_p13) target bundleno = 821 (0x335), region = 135  ;;  %s3496_s24 = smov (!%p2645_p13), 0  }
 0x325   : > { %s3500_s27 = smov (!%p2645_p13), 0  }
 0x32b LB: >> { %v2521_v16 = vld [vmem:[%s3494_s23] sm:$0xff]  ;;  %s2523_s29 = sadd.s32 1, %s3498_s24  ;;  %s2515_s27 = sadd.s32 1, %s3502_s27   ;;  %s3502_s27 = sphi %s3500_s27, %s2515_s27   ;;  %s3498_s24 = sphi %s3496_s24, %s3497_s24   ;;  %s3494_s23 = sphi %s3492_s23, %s2528_s23   ;;  %s3490_s20 = sphi %s3488_s20, %s2529_s20  }
 0x32c   : >> { %2522 = vst [vmem:[%s3490_s20] sm:$0xff] %v2521_v16  ;;  %p2524_p0 = scmp.ge.s32.totalorder %s2523_s29, %s3415_s17  ;;  %p2514_p1 = scmp.ge.s32.totalorder %s2515_s27, %s3415_s17 }
 0x32e   : >> { %s5078_s29 = smov (%p2524_p0, %s2523_s29), 0  ;;  %2517 = sbr.rel (!%p2514_p1) target bundleno = 811 (0x32b), region = 141 }
 0x32f   : >> { %s2646_s28 = sshll.u32 %s5078_s29, 3  ;;  %s3497_s24 = smov %s5078_s29  }
 0x330   : >> { %s2528_s23 = scalar_lea.vmem %s2509_s15, %s2646_s28 [#allocation2]   ;;  %s2529_s20 = scalar_lea.vmem %s2511_s16, %s2646_s28  }
 0x335 PF: > { %p12_p2 = scmp.ge.s32.totalorder %s3550_s22, 6   ;;  %s5070_s18 = smov %s3466_s19 }
 0x336   : > { %s5071_s19 = smov %s3558_s25  ;;  %s5072_s20 = smov %s3550_s22 }
 0x337   :  { %14 = sbr.rel (!%p12_p2) target bundleno = 2 (0x2), region = 152 }

</bundles_post_ra>
